<compile_context>
chip_gen: v7x
topology: tpu7x:2x2x1
jax: 0.10.0
libtpu: 0.0.40
codegen_flags: <defaults>
</compile_context>

<pallas_src>
import math

import jax
import jax.numpy as jnp
from jax.experimental import pallas as pl
from jax.experimental.pallas import tpu as pltpu

BN_EPS = 1e-5
PRELU_ALPHA = 0.25   # nn.PReLU() default; weight_init leaves it untouched.


# ----------------------------------------------------------------------------
# Fused BA2 kernel (one image per grid step, everything VMEM resident)
# ----------------------------------------------------------------------------
def _make_ba2_kernel(C, offsets, hwp, prelu_alpha):
    bf16 = jnp.bfloat16

    def kernel(m_ref, x_ref, y_ref, e_ref,
               wc_ref, w23_ref, w4_ref, wb1_ref, wb2_ref,
               we1_ref, we2_ref, b1_ref, b2_ref,
               yo_ref, eo_ref):
        masks = m_ref[...]                       # (9, HWp) f32 0/1 boundary masks
        x = x_ref[0]                             # (Cin, HWp) f32, lane-dense
        y = y_ref[0]                             # (1,   HWp) f32
        e = e_ref[0]                             # (1,   HWp) f32

        def mm(w, s):                            # bf16 x bf16 -> f32 on the MXU
            return jax.lax.dot_general(w, s, (((1,), (0,)), ((), ())),
                                       preferred_element_type=jnp.float32)

        def prelu(v):
            return jnp.where(v > 0, v, prelu_alpha * v)

        def slab(v):
            """Stacked-K im2col of v (c, HWp) f32 -> (9*c, HWp) bf16.

            Row k*c + ci holds channel ci shifted by offsets[k]
            (k = (dh+1)*3 + (dw+1)), zeroed where the pad=1 3x3 window leaves
            the image -- exactly matching the _pack3x3 weight column order.
            The shifts ride the XLU (pltpu.roll); masks / casts ride the VPU.
            """
            parts = []
            for k, off in enumerate(offsets):
                t = v if off == 0 else pltpu.roll(v, (-off) % hwp, axis=1)
                parts.append((t * masks[k:k + 1, :]).astype(bf16))
            return jnp.concatenate(parts, axis=0)

        # convert: 1x1 conv (folded BN) + PReLU
        xc = prelu(mm(wc_ref[...], x.astype(bf16)))          # (C, HWp) f32
        # reverse attention: x = (1 - sigmoid(y)) * x  (broadcast over channels)
        xa = (1.0 - jax.nn.sigmoid(y)) * xc

        # conve2 + conve3 fused along M: both read cat(xa, y)
        xy = jnp.concatenate([xa, y], axis=0)                 # (C+1, HWp)
        ye = prelu(mm(w23_ref[...], slab(xy)))                # (2C, HWp)
        y1, e0 = ye[:C], ye[C:]

        # conve4(cat(e0, e))
        e1 = prelu(mm(w4_ref[...], slab(jnp.concatenate([e0, e], axis=0))))
        # branch1(cat(e1, y1))
        y2 = prelu(mm(wb1_ref[...], slab(jnp.concatenate([e1, y1], axis=0))))
        # branch2(cat(e1, y2))
        e2 = prelu(mm(wb2_ref[...], slab(jnp.concatenate([e1, y2], axis=0))))

        # edge heads: plain 3x3 conv + bias (no BN / PReLU), then residual add
        e_head = mm(we1_ref[...], slab(e2)) + b1_ref[0]       # (1, HWp)
        y_head = mm(we2_ref[...], slab(y2)) + b2_ref[0]

        eo_ref[0] = (e_head + e).astype(eo_ref.dtype)         # edge1(e2) + e
        yo_ref[0] = (y_head + y).astype(yo_ref.dtype)         # edge2(y2) + y

    return kernel


# ----------------------------------------------------------------------------
# Host-side helpers
# ----------------------------------------------------------------------------
def _boundary_masks(H, W, hwp):
    """(9, hwp) 0/1 masks: mask[k, p] == 1 iff p is a real image pixel and its
    3x3 tap k = (dh+1)*3 + (dw+1) stays inside the image (pad columns -> 0)."""
    HW = H * W
    p = jnp.arange(hwp)
    h, w = p // W, p % W
    in_img = p < HW
    rows = []
    for dh in (-1, 0, 1):
        for dw in (-1, 0, 1):
            rows.append(in_img & (h + dh >= 0) & (h + dh < H)
                        & (w + dw >= 0) & (w + dw < W))
    return jnp.stack(rows, axis=0).astype(jnp.float32)


def _pack3x3(w, scale=1.0):
    """(Cout, Cin, 3, 3) torch-layout conv weight -> (Cout, 9*Cin) packed for
    the stacked-K im2col slab: column index k*Cin + ci with k = kh*3 + kw."""
    co, ci = w.shape[0], w.shape[1]
    return (scale * jnp.transpose(w, (0, 2, 3, 1))).reshape(co, 9 * ci)


def init_params(key, in_channel, out_channel):
    """Torch-layout parameters of BA2(in_channel, out_channel), per weight_init:
    kaiming_normal_(fan_in, relu) conv weights, zero conv biases.  conve1 (its
    output xe is never used) and convr (never called) are omitted."""
    C = out_channel
    kc, k2, k3, k4, kb1, kb2, ke1, ke2 = jax.random.split(key, 8)

    def conv3x3(k, cout, cin):
        std = math.sqrt(2.0 / (9.0 * cin))
        return std * jax.random.normal(k, (cout, cin, 3, 3), jnp.float32)

    return {
        # convert 1x1 conv weight stored squeezed: (C, Cin) == torch (C, Cin, 1, 1)
        "convert_w": math.sqrt(2.0 / in_channel)
                     * jax.random.normal(kc, (C, in_channel), jnp.float32),
        "conve2_w": conv3x3(k2, C, C + 1),
        "conve3_w": conv3x3(k3, C, C + 1),
        "conve4_w": conv3x3(k4, C, C + 1),
        "branch1_w": conv3x3(kb1, C, 2 * C),
        "branch2_w": conv3x3(kb2, C, 2 * C),
        "edge1_w": conv3x3(ke1, 1, C),
        "edge2_w": conv3x3(ke2, 1, C),
        "edge1_b": jnp.zeros((1,), jnp.float32),
        "edge2_b": jnp.zeros((1,), jnp.float32),
    }


def pack_params(raw):
    """Fold inference BatchNorm (fresh stats: scale 1/sqrt(1+eps)) into the conv
    weights, stack the 9 taps along K, fuse conve2/conve3 along M, and cast the
    MXU operands to bf16."""
    bn = 1.0 / math.sqrt(1.0 + BN_EPS)
    bf = jnp.bfloat16
    w23 = jnp.concatenate([_pack3x3(raw["conve2_w"], bn),
                           _pack3x3(raw["conve3_w"], bn)], axis=0)
    return {
        "wc":  (bn * raw["convert_w"]).astype(bf),       # (C, Cin)
        "w23": w23.astype(bf),                           # (2C, 9*(C+1))
        "w4":  _pack3x3(raw["conve4_w"], bn).astype(bf),
        "wb1": _pack3x3(raw["branch1_w"], bn).astype(bf),
        "wb2": _pack3x3(raw["branch2_w"], bn).astype(bf),
        "we1": _pack3x3(raw["edge1_w"]).astype(bf),      # (1, 9C), no BN
        "we2": _pack3x3(raw["edge2_w"]).astype(bf),
        "b1":  raw["edge1_b"],                           # SMEM scalars
        "b2":  raw["edge2_b"],
    }


def ba2_forward(p, x, y, e):
    """BA2 forward.  x: (N, Cin, H, W), y/e: (N, 1, H, W) -> (y_out, e_out)."""
    N, Cin, H, W = x.shape
    C = p["wc"].shape[0]
    HW = H * W
    HWp = ((HW + 127) // 128) * 128      # lane-dense (multiple of 128) flat width

    def flat(a, c):
        a = a.reshape(N, c, HW)
        return a if HWp == HW else jnp.pad(a, ((0, 0), (0, 0), (0, HWp - HW)))

    masks = _boundary_masks(H, W, HWp)
    offsets = [dh * W + dw for dh in (-1, 0, 1) for dw in (-1, 0, 1)]
    weights = (p["wc"], p["w23"], p["w4"], p["wb1"], p["wb2"], p["we1"], p["we2"])

    def img_spec(c):
        return pl.BlockSpec((1, c, HWp), lambda n: (n, 0, 0))

    def full_spec(a):
        nd = a.ndim
        return pl.BlockSpec(a.shape, lambda n: (0,) * nd)

    smem_spec = pl.BlockSpec(memory_space=pltpu.MemorySpace.SMEM)

    y_out, e_out = pl.pallas_call(
        _make_ba2_kernel(C, offsets, HWp, PRELU_ALPHA),
        grid=(N,),
        in_specs=[full_spec(masks), img_spec(Cin), img_spec(1), img_spec(1)]
                 + [full_spec(w) for w in weights]
                 + [smem_spec, smem_spec],
        out_specs=(img_spec(1), img_spec(1)),
        out_shape=(jax.ShapeDtypeStruct((N, 1, HWp), x.dtype),
                   jax.ShapeDtypeStruct((N, 1, HWp), x.dtype)),
        compiler_params=pltpu.CompilerParams(dimension_semantics=("parallel",)),
    )(masks, flat(x, Cin), flat(y, 1), flat(e, 1), *weights, p["b1"], p["b2"])

    y_out = y_out[:, :, :HW].reshape(N, 1, H, W)
    e_out = e_out[:, :, :HW].reshape(N, 1, H, W)
    return y_out, e_out


# ----------------------------------------------------------------------------
# Pure-JAX reference (f32) for validating the kernel
# ----------------------------------------------------------------------------
def _conv3x3_ref(x, w, bias=None):
    out = jax.lax.conv_general_dilated(
        x, w, window_strides=(1, 1), padding=((1, 1), (1, 1)),
        dimension_numbers=("NCHW", "OIHW", "NCHW"),
        precision=jax.lax.Precision.HIGHEST)
    return out if bias is None else out + bias.reshape(1, -1, 1, 1)


def ba2_reference(raw, x, y, e):
    bn = 1.0 / math.sqrt(1.0 + BN_EPS)

    def prelu(v):
        return jnp.where(v > 0, v, PRELU_ALPHA * v)

    xc = prelu(bn * jnp.einsum("oi,nihw->nohw", raw["convert_w"], x,
                               precision=jax.lax.Precision.HIGHEST))
    xa = (1.0 - jax.nn.sigmoid(y)) * xc
    xy = jnp.concatenate([xa, y], axis=1)
    y1 = prelu(bn * _conv3x3_ref(xy, raw["conve2_w"]))
    e0 = prelu(bn * _conv3x3_ref(xy, raw["conve3_w"]))
    e1 = prelu(bn * _conv3x3_ref(jnp.concatenate([e0, e], 1), raw["conve4_w"]))
    y2 = prelu(bn * _conv3x3_ref(jnp.concatenate([e1, y1], 1), raw["branch1_w"]))
    e2 = prelu(bn * _conv3x3_ref(jnp.concatenate([e1, y2], 1), raw["branch2_w"]))
    e_out = _conv3x3_ref(e2, raw["edge1_w"], raw["edge1_b"]) + e
    y_out = _conv3x3_ref(y2, raw["edge2_w"], raw["edge2_b"]) + y
    return y_out, e_out


# ----------------------------------------------------------------------------
if __name__ == "__main__":
    # Toy shapes consistent with the module (real decoder_BG uses BA2(160, 64)
    # and BA2(96, 32) on larger feature maps).
    N, Cin, Cout, H, W = 2, 4, 8, 16, 16

    key = jax.random.PRNGKey(0)
    kp, kx, ky, ke = jax.random.split(key, 4)

    raw = init_params(kp, Cin, Cout)
    params = pack_params(raw)
    x = jax.random.normal(kx, (N, Cin, H, W), jnp.float32)
    y = jax.random.normal(ky, (N, 1, H, W), jnp.float32)
    e = jax.random.normal(ke, (N, 1, H, W), jnp.float32)

    y_out, e_out = jax.jit(ba2_forward)(params, x, y, e)
    jax.block_until_ready((y_out, e_out))

    assert y_out.shape == (N, 1, H, W) and e_out.shape == (N, 1, H, W)
    assert bool(jnp.isfinite(y_out).all()) and bool(jnp.isfinite(e_out).all())

    # Cross-check against the pure-JAX f32 reference; tolerance covers the
    # kernel's bf16 MXU path (structural errors would be orders larger).
    y_ref, e_ref = jax.jit(ba2_reference)(raw, x, y, e)
    err = max(float(jnp.max(jnp.abs(y_out - y_ref))),
              float(jnp.max(jnp.abs(e_out - e_ref))))
    assert err < 0.2, f"kernel vs reference max abs err {err}"

    print("KERNEL_OK")
</pallas_src>

<mosaic_0001>
module attributes {stable_mosaic.version = 11 : i64} {
  func.func @kernel(%arg0: i32, %arg1: memref<9x256xf32, #tpu.memory_space<vmem>>, %arg2: memref<1x4x256xf32, #tpu.memory_space<vmem>>, %arg3: memref<1x1x256xf32, #tpu.memory_space<vmem>>, %arg4: memref<1x1x256xf32, #tpu.memory_space<vmem>>, %arg5: memref<8x4xbf16, #tpu.memory_space<vmem>>, %arg6: memref<16x81xbf16, #tpu.memory_space<vmem>>, %arg7: memref<8x81xbf16, #tpu.memory_space<vmem>>, %arg8: memref<8x144xbf16, #tpu.memory_space<vmem>>, %arg9: memref<8x144xbf16, #tpu.memory_space<vmem>>, %arg10: memref<1x72xbf16, #tpu.memory_space<vmem>>, %arg11: memref<1x72xbf16, #tpu.memory_space<vmem>>, %arg12: memref<1xf32, #tpu.memory_space<smem>>, %arg13: memref<1xf32, #tpu.memory_space<smem>>, %arg14: memref<1x1x256xf32, #tpu.memory_space<vmem>>, %arg15: memref<1x1x256xf32, #tpu.memory_space<vmem>>) attributes {dimension_semantics = [#tpu.dimension_semantics<parallel>], iteration_bounds = array<i64: 2>, scalar_prefetch = 0 : i64, scratch_operands = 0 : i64, tpu.core_type = #tpu.core_type<tc>, window_params = [{pipeline_mode = #tpu.pipeline_mode<synchronous>, transform_indices = @transform_0, window_bounds = array<i64: 9, 256>}, {transform_indices = @transform_1, window_bounds = array<i64: 1, 4, 256>}, {transform_indices = @transform_2, window_bounds = array<i64: 1, 1, 256>}, {transform_indices = @transform_3, window_bounds = array<i64: 1, 1, 256>}, {pipeline_mode = #tpu.pipeline_mode<synchronous>, transform_indices = @transform_4, window_bounds = array<i64: 8, 4>}, {pipeline_mode = #tpu.pipeline_mode<synchronous>, transform_indices = @transform_5, window_bounds = array<i64: 16, 81>}, {pipeline_mode = #tpu.pipeline_mode<synchronous>, transform_indices = @transform_6, window_bounds = array<i64: 8, 81>}, {pipeline_mode = #tpu.pipeline_mode<synchronous>, transform_indices = @transform_7, window_bounds = array<i64: 8, 144>}, {pipeline_mode = #tpu.pipeline_mode<synchronous>, transform_indices = @transform_8, window_bounds = array<i64: 8, 144>}, {pipeline_mode = #tpu.pipeline_mode<synchronous>, transform_indices = @transform_9, window_bounds = array<i64: 1, 72>}, {pipeline_mode = #tpu.pipeline_mode<synchronous>, transform_indices = @transform_10, window_bounds = array<i64: 1, 72>}, {transform_indices = @transform_11, window_bounds = array<i64: 1>}, {transform_indices = @transform_12, window_bounds = array<i64: 1>}, {transform_indices = @transform_13, window_bounds = array<i64: 1, 1, 256>}, {transform_indices = @transform_14, window_bounds = array<i64: 1, 1, 256>}]} {
    %c0 = arith.constant 0 : index
    %c0_0 = arith.constant 0 : index
    %0 = vector.load %arg1[%c0, %c0_0] : memref<9x256xf32, #tpu.memory_space<vmem>>, vector<9x256xf32>
    %c0_1 = arith.constant 0 : index
    %c0_2 = arith.constant 0 : index
    %c0_3 = arith.constant 0 : index
    %1 = vector.load %arg2[%c0_1, %c0_2, %c0_3] : memref<1x4x256xf32, #tpu.memory_space<vmem>>, vector<1x4x256xf32>
    %2 = vector.shape_cast %1 : vector<1x4x256xf32> to vector<4x256xf32>
    %c0_4 = arith.constant 0 : index
    %c0_5 = arith.constant 0 : index
    %c0_6 = arith.constant 0 : index
    %3 = vector.load %arg3[%c0_4, %c0_5, %c0_6] : memref<1x1x256xf32, #tpu.memory_space<vmem>>, vector<1x1x256xf32>
    %4 = vector.shape_cast %3 : vector<1x1x256xf32> to vector<1x256xf32>
    %c0_7 = arith.constant 0 : index
    %c0_8 = arith.constant 0 : index
    %c0_9 = arith.constant 0 : index
    %5 = vector.load %arg4[%c0_7, %c0_8, %c0_9] : memref<1x1x256xf32, #tpu.memory_space<vmem>>, vector<1x1x256xf32>
    %6 = vector.shape_cast %5 : vector<1x1x256xf32> to vector<1x256xf32>
    %c0_10 = arith.constant 0 : index
    %c0_11 = arith.constant 0 : index
    %7 = vector.load %arg5[%c0_10, %c0_11] : memref<8x4xbf16, #tpu.memory_space<vmem>>, vector<8x4xbf16>
    %8 = arith.truncf %2 : vector<4x256xf32> to vector<4x256xbf16>
    %cst = arith.constant dense<0.000000e+00> : vector<8x256xf32>
    %9 = tpu.matmul %7, %8, %cst {dimension_numbers = #tpu.dot_dimension_numbers<[1], [0], [0], [1], [0, 0, 1, 1], [], []>} : vector<8x4xbf16>, vector<4x256xbf16>, vector<8x256xf32> -> vector<8x256xf32>
    %cst_12 = arith.constant 0.000000e+00 : f32
    %10 = vector.broadcast %cst_12 : f32 to vector<8x256xf32>
    %11 = arith.cmpf ogt, %9, %10 : vector<8x256xf32>
    %cst_13 = arith.constant 2.500000e-01 : f32
    %12 = vector.broadcast %cst_13 : f32 to vector<8x256xf32>
    %13 = arith.mulf %12, %9 : vector<8x256xf32>
    %14 = arith.select %11, %9, %13 : vector<8x256xi1>, vector<8x256xf32>
    %15 = arith.negf %4 : vector<1x256xf32>
    %16 = math.exp %15 : vector<1x256xf32>
    %cst_14 = arith.constant 1.000000e+00 : f32
    %17 = vector.broadcast %cst_14 : f32 to vector<1x256xf32>
    %18 = arith.addf %17, %16 : vector<1x256xf32>
    %19 = arith.divf %17, %18 : vector<1x256xf32>
    %cst_15 = arith.constant 1.000000e+00 : f32
    %20 = vector.broadcast %cst_15 : f32 to vector<1x256xf32>
    %21 = arith.subf %20, %19 : vector<1x256xf32>
    %22 = vector.broadcast %21 : vector<1x256xf32> to vector<8x256xf32>
    %23 = arith.mulf %22, %14 : vector<8x256xf32>
    %24 = tpu.concatenate %23, %4 in 0 : vector<8x256xf32>, vector<1x256xf32> -> vector<9x256xf32>
    %c0_16 = arith.constant 0 : index
    %c0_17 = arith.constant 0 : index
    %25 = vector.load %arg6[%c0_16, %c0_17] : memref<16x81xbf16, #tpu.memory_space<vmem>>, vector<16x81xbf16>
    %c17_i32 = arith.constant 17 : i32
    %26 = tpu.dynamic_rotate %24 by %c17_i32 dim 1 : vector<9x256xf32>, i32 -> vector<9x256xf32>
    %27 = vector.extract_strided_slice %0 {offsets = [0, 0], sizes = [1, 256], strides = [1, 1]} : vector<9x256xf32> to vector<1x256xf32>
    %28 = vector.broadcast %27 : vector<1x256xf32> to vector<9x256xf32>
    %29 = arith.mulf %26, %28 : vector<9x256xf32>
    %30 = arith.truncf %29 : vector<9x256xf32> to vector<9x256xbf16>
    %c16_i32 = arith.constant 16 : i32
    %31 = tpu.dynamic_rotate %24 by %c16_i32 dim 1 : vector<9x256xf32>, i32 -> vector<9x256xf32>
    %32 = vector.extract_strided_slice %0 {offsets = [1, 0], sizes = [1, 256], strides = [1, 1]} : vector<9x256xf32> to vector<1x256xf32>
    %33 = vector.broadcast %32 : vector<1x256xf32> to vector<9x256xf32>
    %34 = arith.mulf %31, %33 : vector<9x256xf32>
    %35 = arith.truncf %34 : vector<9x256xf32> to vector<9x256xbf16>
    %c15_i32 = arith.constant 15 : i32
    %36 = tpu.dynamic_rotate %24 by %c15_i32 dim 1 : vector<9x256xf32>, i32 -> vector<9x256xf32>
    %37 = vector.extract_strided_slice %0 {offsets = [2, 0], sizes = [1, 256], strides = [1, 1]} : vector<9x256xf32> to vector<1x256xf32>
    %38 = vector.broadcast %37 : vector<1x256xf32> to vector<9x256xf32>
    %39 = arith.mulf %36, %38 : vector<9x256xf32>
    %40 = arith.truncf %39 : vector<9x256xf32> to vector<9x256xbf16>
    %c1_i32 = arith.constant 1 : i32
    %41 = tpu.dynamic_rotate %24 by %c1_i32 dim 1 : vector<9x256xf32>, i32 -> vector<9x256xf32>
    %42 = vector.extract_strided_slice %0 {offsets = [3, 0], sizes = [1, 256], strides = [1, 1]} : vector<9x256xf32> to vector<1x256xf32>
    %43 = vector.broadcast %42 : vector<1x256xf32> to vector<9x256xf32>
    %44 = arith.mulf %41, %43 : vector<9x256xf32>
    %45 = arith.truncf %44 : vector<9x256xf32> to vector<9x256xbf16>
    %46 = vector.extract_strided_slice %0 {offsets = [4, 0], sizes = [1, 256], strides = [1, 1]} : vector<9x256xf32> to vector<1x256xf32>
    %47 = vector.broadcast %46 : vector<1x256xf32> to vector<9x256xf32>
    %48 = arith.mulf %24, %47 : vector<9x256xf32>
    %49 = arith.truncf %48 : vector<9x256xf32> to vector<9x256xbf16>
    %c255_i32 = arith.constant 255 : i32
    %50 = tpu.dynamic_rotate %24 by %c255_i32 dim 1 : vector<9x256xf32>, i32 -> vector<9x256xf32>
    %51 = vector.extract_strided_slice %0 {offsets = [5, 0], sizes = [1, 256], strides = [1, 1]} : vector<9x256xf32> to vector<1x256xf32>
    %52 = vector.broadcast %51 : vector<1x256xf32> to vector<9x256xf32>
    %53 = arith.mulf %50, %52 : vector<9x256xf32>
    %54 = arith.truncf %53 : vector<9x256xf32> to vector<9x256xbf16>
    %c241_i32 = arith.constant 241 : i32
    %55 = tpu.dynamic_rotate %24 by %c241_i32 dim 1 : vector<9x256xf32>, i32 -> vector<9x256xf32>
    %56 = vector.extract_strided_slice %0 {offsets = [6, 0], sizes = [1, 256], strides = [1, 1]} : vector<9x256xf32> to vector<1x256xf32>
    %57 = vector.broadcast %56 : vector<1x256xf32> to vector<9x256xf32>
    %58 = arith.mulf %55, %57 : vector<9x256xf32>
    %59 = arith.truncf %58 : vector<9x256xf32> to vector<9x256xbf16>
    %c240_i32 = arith.constant 240 : i32
    %60 = tpu.dynamic_rotate %24 by %c240_i32 dim 1 : vector<9x256xf32>, i32 -> vector<9x256xf32>
    %61 = vector.extract_strided_slice %0 {offsets = [7, 0], sizes = [1, 256], strides = [1, 1]} : vector<9x256xf32> to vector<1x256xf32>
    %62 = vector.broadcast %61 : vector<1x256xf32> to vector<9x256xf32>
    %63 = arith.mulf %60, %62 : vector<9x256xf32>
    %64 = arith.truncf %63 : vector<9x256xf32> to vector<9x256xbf16>
    %c239_i32 = arith.constant 239 : i32
    %65 = tpu.dynamic_rotate %24 by %c239_i32 dim 1 : vector<9x256xf32>, i32 -> vector<9x256xf32>
    %66 = vector.extract_strided_slice %0 {offsets = [8, 0], sizes = [1, 256], strides = [1, 1]} : vector<9x256xf32> to vector<1x256xf32>
    %67 = vector.broadcast %66 : vector<1x256xf32> to vector<9x256xf32>
    %68 = arith.mulf %65, %67 : vector<9x256xf32>
    %69 = arith.truncf %68 : vector<9x256xf32> to vector<9x256xbf16>
    %70 = tpu.concatenate %30, %35, %40, %45, %49, %54, %59, %64, %69 in 0 : vector<9x256xbf16>, vector<9x256xbf16>, vector<9x256xbf16>, vector<9x256xbf16>, vector<9x256xbf16>, vector<9x256xbf16>, vector<9x256xbf16>, vector<9x256xbf16>, vector<9x256xbf16> -> vector<81x256xbf16>
    %cst_18 = arith.constant dense<0.000000e+00> : vector<16x256xf32>
    %71 = tpu.matmul %25, %70, %cst_18 {dimension_numbers = #tpu.dot_dimension_numbers<[1], [0], [0], [1], [0, 0, 1, 1], [], []>} : vector<16x81xbf16>, vector<81x256xbf16>, vector<16x256xf32> -> vector<16x256xf32>
    %cst_19 = arith.constant 0.000000e+00 : f32
    %72 = vector.broadcast %cst_19 : f32 to vector<16x256xf32>
    %73 = arith.cmpf ogt, %71, %72 : vector<16x256xf32>
    %cst_20 = arith.constant 2.500000e-01 : f32
    %74 = vector.broadcast %cst_20 : f32 to vector<16x256xf32>
    %75 = arith.mulf %74, %71 : vector<16x256xf32>
    %76 = arith.select %73, %71, %75 : vector<16x256xi1>, vector<16x256xf32>
    %77 = vector.extract_strided_slice %76 {offsets = [0, 0], sizes = [8, 256], strides = [1, 1]} : vector<16x256xf32> to vector<8x256xf32>
    %78 = vector.extract_strided_slice %76 {offsets = [8, 0], sizes = [8, 256], strides = [1, 1]} : vector<16x256xf32> to vector<8x256xf32>
    %c0_21 = arith.constant 0 : index
    %c0_22 = arith.constant 0 : index
    %79 = vector.load %arg7[%c0_21, %c0_22] : memref<8x81xbf16, #tpu.memory_space<vmem>>, vector<8x81xbf16>
    %80 = tpu.concatenate %78, %6 in 0 : vector<8x256xf32>, vector<1x256xf32> -> vector<9x256xf32>
    %c17_i32_23 = arith.constant 17 : i32
    %81 = tpu.dynamic_rotate %80 by %c17_i32_23 dim 1 : vector<9x256xf32>, i32 -> vector<9x256xf32>
    %82 = vector.extract_strided_slice %0 {offsets = [0, 0], sizes = [1, 256], strides = [1, 1]} : vector<9x256xf32> to vector<1x256xf32>
    %83 = vector.broadcast %82 : vector<1x256xf32> to vector<9x256xf32>
    %84 = arith.mulf %81, %83 : vector<9x256xf32>
    %85 = arith.truncf %84 : vector<9x256xf32> to vector<9x256xbf16>
    %c16_i32_24 = arith.constant 16 : i32
    %86 = tpu.dynamic_rotate %80 by %c16_i32_24 dim 1 : vector<9x256xf32>, i32 -> vector<9x256xf32>
    %87 = vector.extract_strided_slice %0 {offsets = [1, 0], sizes = [1, 256], strides = [1, 1]} : vector<9x256xf32> to vector<1x256xf32>
    %88 = vector.broadcast %87 : vector<1x256xf32> to vector<9x256xf32>
    %89 = arith.mulf %86, %88 : vector<9x256xf32>
    %90 = arith.truncf %89 : vector<9x256xf32> to vector<9x256xbf16>
    %c15_i32_25 = arith.constant 15 : i32
    %91 = tpu.dynamic_rotate %80 by %c15_i32_25 dim 1 : vector<9x256xf32>, i32 -> vector<9x256xf32>
    %92 = vector.extract_strided_slice %0 {offsets = [2, 0], sizes = [1, 256], strides = [1, 1]} : vector<9x256xf32> to vector<1x256xf32>
    %93 = vector.broadcast %92 : vector<1x256xf32> to vector<9x256xf32>
    %94 = arith.mulf %91, %93 : vector<9x256xf32>
    %95 = arith.truncf %94 : vector<9x256xf32> to vector<9x256xbf16>
    %c1_i32_26 = arith.constant 1 : i32
    %96 = tpu.dynamic_rotate %80 by %c1_i32_26 dim 1 : vector<9x256xf32>, i32 -> vector<9x256xf32>
    %97 = vector.extract_strided_slice %0 {offsets = [3, 0], sizes = [1, 256], strides = [1, 1]} : vector<9x256xf32> to vector<1x256xf32>
    %98 = vector.broadcast %97 : vector<1x256xf32> to vector<9x256xf32>
    %99 = arith.mulf %96, %98 : vector<9x256xf32>
    %100 = arith.truncf %99 : vector<9x256xf32> to vector<9x256xbf16>
    %101 = vector.extract_strided_slice %0 {offsets = [4, 0], sizes = [1, 256], strides = [1, 1]} : vector<9x256xf32> to vector<1x256xf32>
    %102 = vector.broadcast %101 : vector<1x256xf32> to vector<9x256xf32>
    %103 = arith.mulf %80, %102 : vector<9x256xf32>
    %104 = arith.truncf %103 : vector<9x256xf32> to vector<9x256xbf16>
    %c255_i32_27 = arith.constant 255 : i32
    %105 = tpu.dynamic_rotate %80 by %c255_i32_27 dim 1 : vector<9x256xf32>, i32 -> vector<9x256xf32>
    %106 = vector.extract_strided_slice %0 {offsets = [5, 0], sizes = [1, 256], strides = [1, 1]} : vector<9x256xf32> to vector<1x256xf32>
    %107 = vector.broadcast %106 : vector<1x256xf32> to vector<9x256xf32>
    %108 = arith.mulf %105, %107 : vector<9x256xf32>
    %109 = arith.truncf %108 : vector<9x256xf32> to vector<9x256xbf16>
    %c241_i32_28 = arith.constant 241 : i32
    %110 = tpu.dynamic_rotate %80 by %c241_i32_28 dim 1 : vector<9x256xf32>, i32 -> vector<9x256xf32>
    %111 = vector.extract_strided_slice %0 {offsets = [6, 0], sizes = [1, 256], strides = [1, 1]} : vector<9x256xf32> to vector<1x256xf32>
    %112 = vector.broadcast %111 : vector<1x256xf32> to vector<9x256xf32>
    %113 = arith.mulf %110, %112 : vector<9x256xf32>
    %114 = arith.truncf %113 : vector<9x256xf32> to vector<9x256xbf16>
    %c240_i32_29 = arith.constant 240 : i32
    %115 = tpu.dynamic_rotate %80 by %c240_i32_29 dim 1 : vector<9x256xf32>, i32 -> vector<9x256xf32>
    %116 = vector.extract_strided_slice %0 {offsets = [7, 0], sizes = [1, 256], strides = [1, 1]} : vector<9x256xf32> to vector<1x256xf32>
    %117 = vector.broadcast %116 : vector<1x256xf32> to vector<9x256xf32>
    %118 = arith.mulf %115, %117 : vector<9x256xf32>
    %119 = arith.truncf %118 : vector<9x256xf32> to vector<9x256xbf16>
    %c239_i32_30 = arith.constant 239 : i32
    %120 = tpu.dynamic_rotate %80 by %c239_i32_30 dim 1 : vector<9x256xf32>, i32 -> vector<9x256xf32>
    %121 = vector.extract_strided_slice %0 {offsets = [8, 0], sizes = [1, 256], strides = [1, 1]} : vector<9x256xf32> to vector<1x256xf32>
    %122 = vector.broadcast %121 : vector<1x256xf32> to vector<9x256xf32>
    %123 = arith.mulf %120, %122 : vector<9x256xf32>
    %124 = arith.truncf %123 : vector<9x256xf32> to vector<9x256xbf16>
    %125 = tpu.concatenate %85, %90, %95, %100, %104, %109, %114, %119, %124 in 0 : vector<9x256xbf16>, vector<9x256xbf16>, vector<9x256xbf16>, vector<9x256xbf16>, vector<9x256xbf16>, vector<9x256xbf16>, vector<9x256xbf16>, vector<9x256xbf16>, vector<9x256xbf16> -> vector<81x256xbf16>
    %cst_31 = arith.constant dense<0.000000e+00> : vector<8x256xf32>
    %126 = tpu.matmul %79, %125, %cst_31 {dimension_numbers = #tpu.dot_dimension_numbers<[1], [0], [0], [1], [0, 0, 1, 1], [], []>} : vector<8x81xbf16>, vector<81x256xbf16>, vector<8x256xf32> -> vector<8x256xf32>
    %cst_32 = arith.constant 0.000000e+00 : f32
    %127 = vector.broadcast %cst_32 : f32 to vector<8x256xf32>
    %128 = arith.cmpf ogt, %126, %127 : vector<8x256xf32>
    %cst_33 = arith.constant 2.500000e-01 : f32
    %129 = vector.broadcast %cst_33 : f32 to vector<8x256xf32>
    %130 = arith.mulf %129, %126 : vector<8x256xf32>
    %131 = arith.select %128, %126, %130 : vector<8x256xi1>, vector<8x256xf32>
    %c0_34 = arith.constant 0 : index
    %c0_35 = arith.constant 0 : index
    %132 = vector.load %arg8[%c0_34, %c0_35] : memref<8x144xbf16, #tpu.memory_space<vmem>>, vector<8x144xbf16>
    %133 = tpu.concatenate %131, %77 in 0 : vector<8x256xf32>, vector<8x256xf32> -> vector<16x256xf32>
    %c17_i32_36 = arith.constant 17 : i32
    %134 = tpu.dynamic_rotate %133 by %c17_i32_36 dim 1 : vector<16x256xf32>, i32 -> vector<16x256xf32>
    %135 = vector.extract_strided_slice %0 {offsets = [0, 0], sizes = [1, 256], strides = [1, 1]} : vector<9x256xf32> to vector<1x256xf32>
    %136 = vector.broadcast %135 : vector<1x256xf32> to vector<16x256xf32>
    %137 = arith.mulf %134, %136 : vector<16x256xf32>
    %138 = arith.truncf %137 : vector<16x256xf32> to vector<16x256xbf16>
    %c16_i32_37 = arith.constant 16 : i32
    %139 = tpu.dynamic_rotate %133 by %c16_i32_37 dim 1 : vector<16x256xf32>, i32 -> vector<16x256xf32>
    %140 = vector.extract_strided_slice %0 {offsets = [1, 0], sizes = [1, 256], strides = [1, 1]} : vector<9x256xf32> to vector<1x256xf32>
    %141 = vector.broadcast %140 : vector<1x256xf32> to vector<16x256xf32>
    %142 = arith.mulf %139, %141 : vector<16x256xf32>
    %143 = arith.truncf %142 : vector<16x256xf32> to vector<16x256xbf16>
    %c15_i32_38 = arith.constant 15 : i32
    %144 = tpu.dynamic_rotate %133 by %c15_i32_38 dim 1 : vector<16x256xf32>, i32 -> vector<16x256xf32>
    %145 = vector.extract_strided_slice %0 {offsets = [2, 0], sizes = [1, 256], strides = [1, 1]} : vector<9x256xf32> to vector<1x256xf32>
    %146 = vector.broadcast %145 : vector<1x256xf32> to vector<16x256xf32>
    %147 = arith.mulf %144, %146 : vector<16x256xf32>
    %148 = arith.truncf %147 : vector<16x256xf32> to vector<16x256xbf16>
    %c1_i32_39 = arith.constant 1 : i32
    %149 = tpu.dynamic_rotate %133 by %c1_i32_39 dim 1 : vector<16x256xf32>, i32 -> vector<16x256xf32>
    %150 = vector.extract_strided_slice %0 {offsets = [3, 0], sizes = [1, 256], strides = [1, 1]} : vector<9x256xf32> to vector<1x256xf32>
    %151 = vector.broadcast %150 : vector<1x256xf32> to vector<16x256xf32>
    %152 = arith.mulf %149, %151 : vector<16x256xf32>
    %153 = arith.truncf %152 : vector<16x256xf32> to vector<16x256xbf16>
    %154 = vector.extract_strided_slice %0 {offsets = [4, 0], sizes = [1, 256], strides = [1, 1]} : vector<9x256xf32> to vector<1x256xf32>
    %155 = vector.broadcast %154 : vector<1x256xf32> to vector<16x256xf32>
    %156 = arith.mulf %133, %155 : vector<16x256xf32>
    %157 = arith.truncf %156 : vector<16x256xf32> to vector<16x256xbf16>
    %c255_i32_40 = arith.constant 255 : i32
    %158 = tpu.dynamic_rotate %133 by %c255_i32_40 dim 1 : vector<16x256xf32>, i32 -> vector<16x256xf32>
    %159 = vector.extract_strided_slice %0 {offsets = [5, 0], sizes = [1, 256], strides = [1, 1]} : vector<9x256xf32> to vector<1x256xf32>
    %160 = vector.broadcast %159 : vector<1x256xf32> to vector<16x256xf32>
    %161 = arith.mulf %158, %160 : vector<16x256xf32>
    %162 = arith.truncf %161 : vector<16x256xf32> to vector<16x256xbf16>
    %c241_i32_41 = arith.constant 241 : i32
    %163 = tpu.dynamic_rotate %133 by %c241_i32_41 dim 1 : vector<16x256xf32>, i32 -> vector<16x256xf32>
    %164 = vector.extract_strided_slice %0 {offsets = [6, 0], sizes = [1, 256], strides = [1, 1]} : vector<9x256xf32> to vector<1x256xf32>
    %165 = vector.broadcast %164 : vector<1x256xf32> to vector<16x256xf32>
    %166 = arith.mulf %163, %165 : vector<16x256xf32>
    %167 = arith.truncf %166 : vector<16x256xf32> to vector<16x256xbf16>
    %c240_i32_42 = arith.constant 240 : i32
    %168 = tpu.dynamic_rotate %133 by %c240_i32_42 dim 1 : vector<16x256xf32>, i32 -> vector<16x256xf32>
    %169 = vector.extract_strided_slice %0 {offsets = [7, 0], sizes = [1, 256], strides = [1, 1]} : vector<9x256xf32> to vector<1x256xf32>
    %170 = vector.broadcast %169 : vector<1x256xf32> to vector<16x256xf32>
    %171 = arith.mulf %168, %170 : vector<16x256xf32>
    %172 = arith.truncf %171 : vector<16x256xf32> to vector<16x256xbf16>
    %c239_i32_43 = arith.constant 239 : i32
    %173 = tpu.dynamic_rotate %133 by %c239_i32_43 dim 1 : vector<16x256xf32>, i32 -> vector<16x256xf32>
    %174 = vector.extract_strided_slice %0 {offsets = [8, 0], sizes = [1, 256], strides = [1, 1]} : vector<9x256xf32> to vector<1x256xf32>
    %175 = vector.broadcast %174 : vector<1x256xf32> to vector<16x256xf32>
    %176 = arith.mulf %173, %175 : vector<16x256xf32>
    %177 = arith.truncf %176 : vector<16x256xf32> to vector<16x256xbf16>
    %178 = tpu.concatenate %138, %143, %148, %153, %157, %162, %167, %172, %177 in 0 : vector<16x256xbf16>, vector<16x256xbf16>, vector<16x256xbf16>, vector<16x256xbf16>, vector<16x256xbf16>, vector<16x256xbf16>, vector<16x256xbf16>, vector<16x256xbf16>, vector<16x256xbf16> -> vector<144x256xbf16>
    %cst_44 = arith.constant dense<0.000000e+00> : vector<8x256xf32>
    %179 = tpu.matmul %132, %178, %cst_44 {dimension_numbers = #tpu.dot_dimension_numbers<[1], [0], [0], [1], [0, 0, 1, 1], [], []>} : vector<8x144xbf16>, vector<144x256xbf16>, vector<8x256xf32> -> vector<8x256xf32>
    %cst_45 = arith.constant 0.000000e+00 : f32
    %180 = vector.broadcast %cst_45 : f32 to vector<8x256xf32>
    %181 = arith.cmpf ogt, %179, %180 : vector<8x256xf32>
    %cst_46 = arith.constant 2.500000e-01 : f32
    %182 = vector.broadcast %cst_46 : f32 to vector<8x256xf32>
    %183 = arith.mulf %182, %179 : vector<8x256xf32>
    %184 = arith.select %181, %179, %183 : vector<8x256xi1>, vector<8x256xf32>
    %c0_47 = arith.constant 0 : index
    %c0_48 = arith.constant 0 : index
    %185 = vector.load %arg9[%c0_47, %c0_48] : memref<8x144xbf16, #tpu.memory_space<vmem>>, vector<8x144xbf16>
    %186 = tpu.concatenate %131, %184 in 0 : vector<8x256xf32>, vector<8x256xf32> -> vector<16x256xf32>
    %c17_i32_49 = arith.constant 17 : i32
    %187 = tpu.dynamic_rotate %186 by %c17_i32_49 dim 1 : vector<16x256xf32>, i32 -> vector<16x256xf32>
    %188 = vector.extract_strided_slice %0 {offsets = [0, 0], sizes = [1, 256], strides = [1, 1]} : vector<9x256xf32> to vector<1x256xf32>
    %189 = vector.broadcast %188 : vector<1x256xf32> to vector<16x256xf32>
    %190 = arith.mulf %187, %189 : vector<16x256xf32>
    %191 = arith.truncf %190 : vector<16x256xf32> to vector<16x256xbf16>
    %c16_i32_50 = arith.constant 16 : i32
    %192 = tpu.dynamic_rotate %186 by %c16_i32_50 dim 1 : vector<16x256xf32>, i32 -> vector<16x256xf32>
    %193 = vector.extract_strided_slice %0 {offsets = [1, 0], sizes = [1, 256], strides = [1, 1]} : vector<9x256xf32> to vector<1x256xf32>
    %194 = vector.broadcast %193 : vector<1x256xf32> to vector<16x256xf32>
    %195 = arith.mulf %192, %194 : vector<16x256xf32>
    %196 = arith.truncf %195 : vector<16x256xf32> to vector<16x256xbf16>
    %c15_i32_51 = arith.constant 15 : i32
    %197 = tpu.dynamic_rotate %186 by %c15_i32_51 dim 1 : vector<16x256xf32>, i32 -> vector<16x256xf32>
    %198 = vector.extract_strided_slice %0 {offsets = [2, 0], sizes = [1, 256], strides = [1, 1]} : vector<9x256xf32> to vector<1x256xf32>
    %199 = vector.broadcast %198 : vector<1x256xf32> to vector<16x256xf32>
    %200 = arith.mulf %197, %199 : vector<16x256xf32>
    %201 = arith.truncf %200 : vector<16x256xf32> to vector<16x256xbf16>
    %c1_i32_52 = arith.constant 1 : i32
    %202 = tpu.dynamic_rotate %186 by %c1_i32_52 dim 1 : vector<16x256xf32>, i32 -> vector<16x256xf32>
    %203 = vector.extract_strided_slice %0 {offsets = [3, 0], sizes = [1, 256], strides = [1, 1]} : vector<9x256xf32> to vector<1x256xf32>
    %204 = vector.broadcast %203 : vector<1x256xf32> to vector<16x256xf32>
    %205 = arith.mulf %202, %204 : vector<16x256xf32>
    %206 = arith.truncf %205 : vector<16x256xf32> to vector<16x256xbf16>
    %207 = vector.extract_strided_slice %0 {offsets = [4, 0], sizes = [1, 256], strides = [1, 1]} : vector<9x256xf32> to vector<1x256xf32>
    %208 = vector.broadcast %207 : vector<1x256xf32> to vector<16x256xf32>
    %209 = arith.mulf %186, %208 : vector<16x256xf32>
    %210 = arith.truncf %209 : vector<16x256xf32> to vector<16x256xbf16>
    %c255_i32_53 = arith.constant 255 : i32
    %211 = tpu.dynamic_rotate %186 by %c255_i32_53 dim 1 : vector<16x256xf32>, i32 -> vector<16x256xf32>
    %212 = vector.extract_strided_slice %0 {offsets = [5, 0], sizes = [1, 256], strides = [1, 1]} : vector<9x256xf32> to vector<1x256xf32>
    %213 = vector.broadcast %212 : vector<1x256xf32> to vector<16x256xf32>
    %214 = arith.mulf %211, %213 : vector<16x256xf32>
    %215 = arith.truncf %214 : vector<16x256xf32> to vector<16x256xbf16>
    %c241_i32_54 = arith.constant 241 : i32
    %216 = tpu.dynamic_rotate %186 by %c241_i32_54 dim 1 : vector<16x256xf32>, i32 -> vector<16x256xf32>
    %217 = vector.extract_strided_slice %0 {offsets = [6, 0], sizes = [1, 256], strides = [1, 1]} : vector<9x256xf32> to vector<1x256xf32>
    %218 = vector.broadcast %217 : vector<1x256xf32> to vector<16x256xf32>
    %219 = arith.mulf %216, %218 : vector<16x256xf32>
    %220 = arith.truncf %219 : vector<16x256xf32> to vector<16x256xbf16>
    %c240_i32_55 = arith.constant 240 : i32
    %221 = tpu.dynamic_rotate %186 by %c240_i32_55 dim 1 : vector<16x256xf32>, i32 -> vector<16x256xf32>
    %222 = vector.extract_strided_slice %0 {offsets = [7, 0], sizes = [1, 256], strides = [1, 1]} : vector<9x256xf32> to vector<1x256xf32>
    %223 = vector.broadcast %222 : vector<1x256xf32> to vector<16x256xf32>
    %224 = arith.mulf %221, %223 : vector<16x256xf32>
    %225 = arith.truncf %224 : vector<16x256xf32> to vector<16x256xbf16>
    %c239_i32_56 = arith.constant 239 : i32
    %226 = tpu.dynamic_rotate %186 by %c239_i32_56 dim 1 : vector<16x256xf32>, i32 -> vector<16x256xf32>
    %227 = vector.extract_strided_slice %0 {offsets = [8, 0], sizes = [1, 256], strides = [1, 1]} : vector<9x256xf32> to vector<1x256xf32>
    %228 = vector.broadcast %227 : vector<1x256xf32> to vector<16x256xf32>
    %229 = arith.mulf %226, %228 : vector<16x256xf32>
    %230 = arith.truncf %229 : vector<16x256xf32> to vector<16x256xbf16>
    %231 = tpu.concatenate %191, %196, %201, %206, %210, %215, %220, %225, %230 in 0 : vector<16x256xbf16>, vector<16x256xbf16>, vector<16x256xbf16>, vector<16x256xbf16>, vector<16x256xbf16>, vector<16x256xbf16>, vector<16x256xbf16>, vector<16x256xbf16>, vector<16x256xbf16> -> vector<144x256xbf16>
    %cst_57 = arith.constant dense<0.000000e+00> : vector<8x256xf32>
    %232 = tpu.matmul %185, %231, %cst_57 {dimension_numbers = #tpu.dot_dimension_numbers<[1], [0], [0], [1], [0, 0, 1, 1], [], []>} : vector<8x144xbf16>, vector<144x256xbf16>, vector<8x256xf32> -> vector<8x256xf32>
    %cst_58 = arith.constant 0.000000e+00 : f32
    %233 = vector.broadcast %cst_58 : f32 to vector<8x256xf32>
    %234 = arith.cmpf ogt, %232, %233 : vector<8x256xf32>
    %cst_59 = arith.constant 2.500000e-01 : f32
    %235 = vector.broadcast %cst_59 : f32 to vector<8x256xf32>
    %236 = arith.mulf %235, %232 : vector<8x256xf32>
    %237 = arith.select %234, %232, %236 : vector<8x256xi1>, vector<8x256xf32>
    %c0_60 = arith.constant 0 : index
    %c0_61 = arith.constant 0 : index
    %238 = vector.load %arg10[%c0_60, %c0_61] : memref<1x72xbf16, #tpu.memory_space<vmem>>, vector<1x72xbf16>
    %c17_i32_62 = arith.constant 17 : i32
    %239 = tpu.dynamic_rotate %237 by %c17_i32_62 dim 1 : vector<8x256xf32>, i32 -> vector<8x256xf32>
    %240 = vector.extract_strided_slice %0 {offsets = [0, 0], sizes = [1, 256], strides = [1, 1]} : vector<9x256xf32> to vector<1x256xf32>
    %241 = vector.broadcast %240 : vector<1x256xf32> to vector<8x256xf32>
    %242 = arith.mulf %239, %241 : vector<8x256xf32>
    %243 = arith.truncf %242 : vector<8x256xf32> to vector<8x256xbf16>
    %c16_i32_63 = arith.constant 16 : i32
    %244 = tpu.dynamic_rotate %237 by %c16_i32_63 dim 1 : vector<8x256xf32>, i32 -> vector<8x256xf32>
    %245 = vector.extract_strided_slice %0 {offsets = [1, 0], sizes = [1, 256], strides = [1, 1]} : vector<9x256xf32> to vector<1x256xf32>
    %246 = vector.broadcast %245 : vector<1x256xf32> to vector<8x256xf32>
    %247 = arith.mulf %244, %246 : vector<8x256xf32>
    %248 = arith.truncf %247 : vector<8x256xf32> to vector<8x256xbf16>
    %c15_i32_64 = arith.constant 15 : i32
    %249 = tpu.dynamic_rotate %237 by %c15_i32_64 dim 1 : vector<8x256xf32>, i32 -> vector<8x256xf32>
    %250 = vector.extract_strided_slice %0 {offsets = [2, 0], sizes = [1, 256], strides = [1, 1]} : vector<9x256xf32> to vector<1x256xf32>
    %251 = vector.broadcast %250 : vector<1x256xf32> to vector<8x256xf32>
    %252 = arith.mulf %249, %251 : vector<8x256xf32>
    %253 = arith.truncf %252 : vector<8x256xf32> to vector<8x256xbf16>
    %c1_i32_65 = arith.constant 1 : i32
    %254 = tpu.dynamic_rotate %237 by %c1_i32_65 dim 1 : vector<8x256xf32>, i32 -> vector<8x256xf32>
    %255 = vector.extract_strided_slice %0 {offsets = [3, 0], sizes = [1, 256], strides = [1, 1]} : vector<9x256xf32> to vector<1x256xf32>
    %256 = vector.broadcast %255 : vector<1x256xf32> to vector<8x256xf32>
    %257 = arith.mulf %254, %256 : vector<8x256xf32>
    %258 = arith.truncf %257 : vector<8x256xf32> to vector<8x256xbf16>
    %259 = vector.extract_strided_slice %0 {offsets = [4, 0], sizes = [1, 256], strides = [1, 1]} : vector<9x256xf32> to vector<1x256xf32>
    %260 = vector.broadcast %259 : vector<1x256xf32> to vector<8x256xf32>
    %261 = arith.mulf %237, %260 : vector<8x256xf32>
    %262 = arith.truncf %261 : vector<8x256xf32> to vector<8x256xbf16>
    %c255_i32_66 = arith.constant 255 : i32
    %263 = tpu.dynamic_rotate %237 by %c255_i32_66 dim 1 : vector<8x256xf32>, i32 -> vector<8x256xf32>
    %264 = vector.extract_strided_slice %0 {offsets = [5, 0], sizes = [1, 256], strides = [1, 1]} : vector<9x256xf32> to vector<1x256xf32>
    %265 = vector.broadcast %264 : vector<1x256xf32> to vector<8x256xf32>
    %266 = arith.mulf %263, %265 : vector<8x256xf32>
    %267 = arith.truncf %266 : vector<8x256xf32> to vector<8x256xbf16>
    %c241_i32_67 = arith.constant 241 : i32
    %268 = tpu.dynamic_rotate %237 by %c241_i32_67 dim 1 : vector<8x256xf32>, i32 -> vector<8x256xf32>
    %269 = vector.extract_strided_slice %0 {offsets = [6, 0], sizes = [1, 256], strides = [1, 1]} : vector<9x256xf32> to vector<1x256xf32>
    %270 = vector.broadcast %269 : vector<1x256xf32> to vector<8x256xf32>
    %271 = arith.mulf %268, %270 : vector<8x256xf32>
    %272 = arith.truncf %271 : vector<8x256xf32> to vector<8x256xbf16>
    %c240_i32_68 = arith.constant 240 : i32
    %273 = tpu.dynamic_rotate %237 by %c240_i32_68 dim 1 : vector<8x256xf32>, i32 -> vector<8x256xf32>
    %274 = vector.extract_strided_slice %0 {offsets = [7, 0], sizes = [1, 256], strides = [1, 1]} : vector<9x256xf32> to vector<1x256xf32>
    %275 = vector.broadcast %274 : vector<1x256xf32> to vector<8x256xf32>
    %276 = arith.mulf %273, %275 : vector<8x256xf32>
    %277 = arith.truncf %276 : vector<8x256xf32> to vector<8x256xbf16>
    %c239_i32_69 = arith.constant 239 : i32
    %278 = tpu.dynamic_rotate %237 by %c239_i32_69 dim 1 : vector<8x256xf32>, i32 -> vector<8x256xf32>
    %279 = vector.extract_strided_slice %0 {offsets = [8, 0], sizes = [1, 256], strides = [1, 1]} : vector<9x256xf32> to vector<1x256xf32>
    %280 = vector.broadcast %279 : vector<1x256xf32> to vector<8x256xf32>
    %281 = arith.mulf %278, %280 : vector<8x256xf32>
    %282 = arith.truncf %281 : vector<8x256xf32> to vector<8x256xbf16>
    %283 = tpu.concatenate %243, %248, %253, %258, %262, %267, %272, %277, %282 in 0 : vector<8x256xbf16>, vector<8x256xbf16>, vector<8x256xbf16>, vector<8x256xbf16>, vector<8x256xbf16>, vector<8x256xbf16>, vector<8x256xbf16>, vector<8x256xbf16>, vector<8x256xbf16> -> vector<72x256xbf16>
    %cst_70 = arith.constant dense<0.000000e+00> : vector<1x256xf32>
    %284 = tpu.matmul %238, %283, %cst_70 {dimension_numbers = #tpu.dot_dimension_numbers<[1], [0], [0], [1], [0, 0, 1, 1], [], []>} : vector<1x72xbf16>, vector<72x256xbf16>, vector<1x256xf32> -> vector<1x256xf32>
    %c0_71 = arith.constant 0 : index
    %285 = memref.load %arg12[%c0_71] : memref<1xf32, #tpu.memory_space<smem>>
    %286 = vector.broadcast %285 : f32 to vector<1x256xf32>
    %287 = arith.addf %284, %286 : vector<1x256xf32>
    %c0_72 = arith.constant 0 : index
    %c0_73 = arith.constant 0 : index
    %288 = vector.load %arg11[%c0_72, %c0_73] : memref<1x72xbf16, #tpu.memory_space<vmem>>, vector<1x72xbf16>
    %c17_i32_74 = arith.constant 17 : i32
    %289 = tpu.dynamic_rotate %184 by %c17_i32_74 dim 1 : vector<8x256xf32>, i32 -> vector<8x256xf32>
    %290 = vector.extract_strided_slice %0 {offsets = [0, 0], sizes = [1, 256], strides = [1, 1]} : vector<9x256xf32> to vector<1x256xf32>
    %291 = vector.broadcast %290 : vector<1x256xf32> to vector<8x256xf32>
    %292 = arith.mulf %289, %291 : vector<8x256xf32>
    %293 = arith.truncf %292 : vector<8x256xf32> to vector<8x256xbf16>
    %c16_i32_75 = arith.constant 16 : i32
    %294 = tpu.dynamic_rotate %184 by %c16_i32_75 dim 1 : vector<8x256xf32>, i32 -> vector<8x256xf32>
    %295 = vector.extract_strided_slice %0 {offsets = [1, 0], sizes = [1, 256], strides = [1, 1]} : vector<9x256xf32> to vector<1x256xf32>
    %296 = vector.broadcast %295 : vector<1x256xf32> to vector<8x256xf32>
    %297 = arith.mulf %294, %296 : vector<8x256xf32>
    %298 = arith.truncf %297 : vector<8x256xf32> to vector<8x256xbf16>
    %c15_i32_76 = arith.constant 15 : i32
    %299 = tpu.dynamic_rotate %184 by %c15_i32_76 dim 1 : vector<8x256xf32>, i32 -> vector<8x256xf32>
    %300 = vector.extract_strided_slice %0 {offsets = [2, 0], sizes = [1, 256], strides = [1, 1]} : vector<9x256xf32> to vector<1x256xf32>
    %301 = vector.broadcast %300 : vector<1x256xf32> to vector<8x256xf32>
    %302 = arith.mulf %299, %301 : vector<8x256xf32>
    %303 = arith.truncf %302 : vector<8x256xf32> to vector<8x256xbf16>
    %c1_i32_77 = arith.constant 1 : i32
    %304 = tpu.dynamic_rotate %184 by %c1_i32_77 dim 1 : vector<8x256xf32>, i32 -> vector<8x256xf32>
    %305 = vector.extract_strided_slice %0 {offsets = [3, 0], sizes = [1, 256], strides = [1, 1]} : vector<9x256xf32> to vector<1x256xf32>
    %306 = vector.broadcast %305 : vector<1x256xf32> to vector<8x256xf32>
    %307 = arith.mulf %304, %306 : vector<8x256xf32>
    %308 = arith.truncf %307 : vector<8x256xf32> to vector<8x256xbf16>
    %309 = vector.extract_strided_slice %0 {offsets = [4, 0], sizes = [1, 256], strides = [1, 1]} : vector<9x256xf32> to vector<1x256xf32>
    %310 = vector.broadcast %309 : vector<1x256xf32> to vector<8x256xf32>
    %311 = arith.mulf %184, %310 : vector<8x256xf32>
    %312 = arith.truncf %311 : vector<8x256xf32> to vector<8x256xbf16>
    %c255_i32_78 = arith.constant 255 : i32
    %313 = tpu.dynamic_rotate %184 by %c255_i32_78 dim 1 : vector<8x256xf32>, i32 -> vector<8x256xf32>
    %314 = vector.extract_strided_slice %0 {offsets = [5, 0], sizes = [1, 256], strides = [1, 1]} : vector<9x256xf32> to vector<1x256xf32>
    %315 = vector.broadcast %314 : vector<1x256xf32> to vector<8x256xf32>
    %316 = arith.mulf %313, %315 : vector<8x256xf32>
    %317 = arith.truncf %316 : vector<8x256xf32> to vector<8x256xbf16>
    %c241_i32_79 = arith.constant 241 : i32
    %318 = tpu.dynamic_rotate %184 by %c241_i32_79 dim 1 : vector<8x256xf32>, i32 -> vector<8x256xf32>
    %319 = vector.extract_strided_slice %0 {offsets = [6, 0], sizes = [1, 256], strides = [1, 1]} : vector<9x256xf32> to vector<1x256xf32>
    %320 = vector.broadcast %319 : vector<1x256xf32> to vector<8x256xf32>
    %321 = arith.mulf %318, %320 : vector<8x256xf32>
    %322 = arith.truncf %321 : vector<8x256xf32> to vector<8x256xbf16>
    %c240_i32_80 = arith.constant 240 : i32
    %323 = tpu.dynamic_rotate %184 by %c240_i32_80 dim 1 : vector<8x256xf32>, i32 -> vector<8x256xf32>
    %324 = vector.extract_strided_slice %0 {offsets = [7, 0], sizes = [1, 256], strides = [1, 1]} : vector<9x256xf32> to vector<1x256xf32>
    %325 = vector.broadcast %324 : vector<1x256xf32> to vector<8x256xf32>
    %326 = arith.mulf %323, %325 : vector<8x256xf32>
    %327 = arith.truncf %326 : vector<8x256xf32> to vector<8x256xbf16>
    %c239_i32_81 = arith.constant 239 : i32
    %328 = tpu.dynamic_rotate %184 by %c239_i32_81 dim 1 : vector<8x256xf32>, i32 -> vector<8x256xf32>
    %329 = vector.extract_strided_slice %0 {offsets = [8, 0], sizes = [1, 256], strides = [1, 1]} : vector<9x256xf32> to vector<1x256xf32>
    %330 = vector.broadcast %329 : vector<1x256xf32> to vector<8x256xf32>
    %331 = arith.mulf %328, %330 : vector<8x256xf32>
    %332 = arith.truncf %331 : vector<8x256xf32> to vector<8x256xbf16>
    %333 = tpu.concatenate %293, %298, %303, %308, %312, %317, %322, %327, %332 in 0 : vector<8x256xbf16>, vector<8x256xbf16>, vector<8x256xbf16>, vector<8x256xbf16>, vector<8x256xbf16>, vector<8x256xbf16>, vector<8x256xbf16>, vector<8x256xbf16>, vector<8x256xbf16> -> vector<72x256xbf16>
    %cst_82 = arith.constant dense<0.000000e+00> : vector<1x256xf32>
    %334 = tpu.matmul %288, %333, %cst_82 {dimension_numbers = #tpu.dot_dimension_numbers<[1], [0], [0], [1], [0, 0, 1, 1], [], []>} : vector<1x72xbf16>, vector<72x256xbf16>, vector<1x256xf32> -> vector<1x256xf32>
    %c0_83 = arith.constant 0 : index
    %335 = memref.load %arg13[%c0_83] : memref<1xf32, #tpu.memory_space<smem>>
    %336 = vector.broadcast %335 : f32 to vector<1x256xf32>
    %337 = arith.addf %334, %336 : vector<1x256xf32>
    %338 = arith.addf %287, %6 : vector<1x256xf32>
    %c0_84 = arith.constant 0 : index
    %c0_85 = arith.constant 0 : index
    %c0_86 = arith.constant 0 : index
    %339 = vector.load %arg15[%c0_84, %c0_85, %c0_86] : memref<1x1x256xf32, #tpu.memory_space<vmem>>, vector<1x1x256xf32>
    %340 = vector.shape_cast %339 : vector<1x1x256xf32> to vector<1x256xf32>
    %341 = vector.shape_cast %338 : vector<1x256xf32> to vector<1x1x256xf32>
    tpu.vector_store %arg15[%c0_84, %c0_85, %c0_86], %341 {strides = array<i32>} : memref<1x1x256xf32, #tpu.memory_space<vmem>>, vector<1x1x256xf32>,
    %342 = arith.addf %337, %4 : vector<1x256xf32>
    %c0_87 = arith.constant 0 : index
    %c0_88 = arith.constant 0 : index
    %c0_89 = arith.constant 0 : index
    %343 = vector.load %arg14[%c0_87, %c0_88, %c0_89] : memref<1x1x256xf32, #tpu.memory_space<vmem>>, vector<1x1x256xf32>
    %344 = vector.shape_cast %343 : vector<1x1x256xf32> to vector<1x256xf32>
    %345 = vector.shape_cast %342 : vector<1x256xf32> to vector<1x1x256xf32>
    tpu.vector_store %arg14[%c0_87, %c0_88, %c0_89], %345 {strides = array<i32>} : memref<1x1x256xf32, #tpu.memory_space<vmem>>, vector<1x1x256xf32>,
    return
  }
  func.func @transform_0(%arg0: i32) -> (i32, i32) {
    %c0_i32 = arith.constant 0 : i32
    %c0_i32_0 = arith.constant 0 : i32
    %c0_i32_1 = arith.constant 0 : i32
    return %c0_i32, %c0_i32_0 : i32, i32
  }
  func.func @transform_1(%arg0: i32) -> (i32, i32, i32) {
    %c0_i32 = arith.constant 0 : i32
    %c0_i32_0 = arith.constant 0 : i32
    %c0_i32_1 = arith.constant 0 : i32
    return %arg0, %c0_i32, %c0_i32_0 : i32, i32, i32
  }
  func.func @transform_2(%arg0: i32) -> (i32, i32, i32) {
    %c0_i32 = arith.constant 0 : i32
    %c0_i32_0 = arith.constant 0 : i32
    %c0_i32_1 = arith.constant 0 : i32
    return %arg0, %c0_i32, %c0_i32_0 : i32, i32, i32
  }
  func.func @transform_3(%arg0: i32) -> (i32, i32, i32) {
    %c0_i32 = arith.constant 0 : i32
    %c0_i32_0 = arith.constant 0 : i32
    %c0_i32_1 = arith.constant 0 : i32
    return %arg0, %c0_i32, %c0_i32_0 : i32, i32, i32
  }
  func.func @transform_4(%arg0: i32) -> (i32, i32) {
    %c0_i32 = arith.constant 0 : i32
    %c0_i32_0 = arith.constant 0 : i32
    %c0_i32_1 = arith.constant 0 : i32
    return %c0_i32, %c0_i32_0 : i32, i32
  }
  func.func @transform_5(%arg0: i32) -> (i32, i32) {
    %c0_i32 = arith.constant 0 : i32
    %c0_i32_0 = arith.constant 0 : i32
    %c0_i32_1 = arith.constant 0 : i32
    return %c0_i32, %c0_i32_0 : i32, i32
  }
  func.func @transform_6(%arg0: i32) -> (i32, i32) {
    %c0_i32 = arith.constant 0 : i32
    %c0_i32_0 = arith.constant 0 : i32
    %c0_i32_1 = arith.constant 0 : i32
    return %c0_i32, %c0_i32_0 : i32, i32
  }
  func.func @transform_7(%arg0: i32) -> (i32, i32) {
    %c0_i32 = arith.constant 0 : i32
    %c0_i32_0 = arith.constant 0 : i32
    %c0_i32_1 = arith.constant 0 : i32
    return %c0_i32, %c0_i32_0 : i32, i32
  }
  func.func @transform_8(%arg0: i32) -> (i32, i32) {
    %c0_i32 = arith.constant 0 : i32
    %c0_i32_0 = arith.constant 0 : i32
    %c0_i32_1 = arith.constant 0 : i32
    return %c0_i32, %c0_i32_0 : i32, i32
  }
  func.func @transform_9(%arg0: i32) -> (i32, i32) {
    %c0_i32 = arith.constant 0 : i32
    %c0_i32_0 = arith.constant 0 : i32
    %c0_i32_1 = arith.constant 0 : i32
    return %c0_i32, %c0_i32_0 : i32, i32
  }
  func.func @transform_10(%arg0: i32) -> (i32, i32) {
    %c0_i32 = arith.constant 0 : i32
    %c0_i32_0 = arith.constant 0 : i32
    %c0_i32_1 = arith.constant 0 : i32
    return %c0_i32, %c0_i32_0 : i32, i32
  }
  func.func @transform_11(%arg0: i32) -> i32 {
    %c0_i32 = arith.constant 0 : i32
    %c0_i32_0 = arith.constant 0 : i32
    return %c0_i32 : i32
  }
  func.func @transform_12(%arg0: i32) -> i32 {
    %c0_i32 = arith.constant 0 : i32
    %c0_i32_0 = arith.constant 0 : i32
    return %c0_i32 : i32
  }
  func.func @transform_13(%arg0: i32) -> (i32, i32, i32) {
    %c0_i32 = arith.constant 0 : i32
    %c0_i32_0 = arith.constant 0 : i32
    %c0_i32_1 = arith.constant 0 : i32
    return %arg0, %c0_i32, %c0_i32_0 : i32, i32, i32
  }
  func.func @transform_14(%arg0: i32) -> (i32, i32, i32) {
    %c0_i32 = arith.constant 0 : i32
    %c0_i32_0 = arith.constant 0 : i32
    %c0_i32_1 = arith.constant 0 : i32
    return %arg0, %c0_i32, %c0_i32_0 : i32, i32, i32
  }
}

</mosaic_0001>

<bundles_post_ra>
// kernel: ba2_forward.1
= control target key start
LH: loop header
LB: loop body
LE: loop exit
PB: predicated region body
PF: predicated region fallthrough
CT: control target
= control target key end

     0   :  { %s2372_s17 = smov 0   ;;  %s3617_s0 = inlined_call_operand.vmem [shape: f32[9,256], index: 0, kind: input, shape index: {}]   ;;  %s3618_s1 = inlined_call_operand.vmem [shape: f32[2,4,256], index: 1, kind: input, shape index: {}]   ;;  %s3619_s2 = inlined_call_operand.vmem [shape: f32[2,1,256], index: 2, kind: input, shape index: {}]   ;;  %s3620_s3 = inlined_call_operand.vmem [shape: f32[2,1,256], index: 3, kind: input, shape index: {}]   ;;  %s3621_s4 = inlined_call_operand.vmem [shape: bf16[8,4], index: 4, kind: input, shape index: {}]   ;;  %s3622_s5 = inlined_call_operand.vmem [shape: bf16[16,81], index: 5, kind: input, shape index: {}]   ;;  %s3623_s6 = inlined_call_operand.vmem [shape: bf16[8,81], index: 6, kind: input, shape index: {}]   ;;  %s3624_s7 = inlined_call_operand.vmem [shape: bf16[8,144], index: 7, kind: input, shape index: {}]   ;;  %s3625_s8 = inlined_call_operand.vmem [shape: bf16[8,144], index: 8, kind: input, shape index: {}]   ;;  %s3626_s9 = inlined_call_operand.vmem [shape: bf16[1,72], index: 9, kind: input, shape index: {}]   ;;  %s3627_s10 = inlined_call_operand.vmem [shape: bf16[1,72], index: 10, kind: input, shape index: {}]   ;;  %s3628_s11 = inlined_call_operand.<no memory space> [shape: f32[1], index: 11, kind: input, shape index: {}]   ;;  %s3629_s12 = inlined_call_operand.<no memory space> [shape: f32[1], index: 12, kind: input, shape index: {}]   ;;  %s3630_s13 = inlined_call_operand.vmem [shape: f32[2,1,256], index: 13, kind: output, shape index: {0}]   ;;  %s3631_s14 = inlined_call_operand.vmem [shape: f32[2,1,256], index: 14, kind: output, shape index: {1}]  }
   0x1   :  { %20 = sst [smem:[#allocation2]] %s3628_s11 }
   0x2   :  { %21 = sst [smem:[#allocation3]] %s3629_s12 }
   0x3 LB: > { %s2211_s18 = sadd.s32 4294967295, %s2279_s17   ;;  %p2215_p0 = scmp.ge.s32.totalorder %s2279_s17, 1  ;;  %s2279_s17 = sphi %s2372_s17, %s27_s17  }
   0x4   : > { %p435_p1 = scmp.lt.s32.totalorder %s2279_s17, 3 }
   0x6   : > { %p436_p2 = pnand %p2215_p0, %p435_p1 }
   0x8   : > { %439 = sbr.rel (%p436_p2) target bundleno = 2205 (0x89d), region = 72 }
   0xf   : > { %p492_p3 = scmp.lt.s32.totalorder %s2211_s18, 1  ;;  %v3636_v0 = vlaneseq  ;;  %v3637_v1 = vmov 0   ;;  %vm3635_vm0 = vcmask 1041408   ;;  %s2282_s25 = smov 16   ;;  %v521_v13 = vld [vmem:[%s3621_s4] sm:$0xf] }
  0x10   : > { %570 = vmatprep.mubr.bf16.mxu0 %v3637_v1  ;;  %1038 = vmatprep.mubr.bf16.mxu1 %v3637_v1  ;;  %vm527_vm1 = vcmask 31744   ;;  %s2283_s28 = smov 1   ;;  %s2284_s29 = smov 17   ;;  %v2530_v47 = vld [vmem:[%s3617_s0] sm:$0xff]  ;;  %v2535_v48 = vld [vmem:[%s3617_s0 + $0x8] sm:$0xff]  ;;  %vm936_vm10 = vcmask 1044480  }
  0x11   : > { %s3710_s18 = smov (!%p492_p3, %s2211_s18), 1  ;;  %v2383_v2 = vshrl.u32 %v3636_v0, 7  ;;  %s2285_s30 = smov 15   ;;  %v2548_v53 = vand.u32 127, %v3636_v0  ;;  %vm937_vm11 = vsmask.f32 4352 }
  0x12   : > { %s2242_s11 = sshll.u32 %s3710_s18, 3  ;;  %s2385_s12 = sshll.u32 %s3710_s18, 1  ;;  %vm950_vm12 = vcmask 1045504   ;;  %vm941_vm14 = vcmask 1040384   ;;  %vm951_vm15 = vsmask.f32 5376 }
  0x13   : > { %3646 = vst [vmem:[#allocation4_spill] sm:$0xff] %v2383_v2  ;;  %v2388_v3 = vsub.s32 0, %v2383_v2  ;;  %v2391_v4 = vsub.s32 1, %v2383_v2  ;;  %s496_s21 = scalar_lea.vmem %s3618_s1, %s2242_s11  ;;  %s500_s24 = scalar_lea.vmem %s3619_s2, %s2385_s12  ;;  %v730_v46 = vsub.s32 4, %v2383_v2  ;;  %v716_v56 = vsub.s32 3, %v2383_v2 }
  0x14   : > { %v518_v5 = vld [vmem:[%s496_s21] sm:$0xff]  ;;  %s2286_s15 = smov 127   ;;  %s2287_s16 = smov 112   ;;  %vm709_vm4 = vcmp.lt.s32.totalorder %v2548_v53, 1  ;;  %vm628_vm5 = vcmp.lt.s32.totalorder %v2548_v53, 17  ;;  %v689_v59 = vsub.s32 2, %v2383_v2 }
  0x15   : > { %v519_v6 = vld [vmem:[%s500_s24] sm:$0x3]  ;;  %v523_v7 = vcombine.high %v518_v5, %v518_v5  ;;  %v525_v10 = vpack.c.bf16 %v518_v5, %v518_v5  ;;  %s2288_s18 = smov 113   ;;  %s504_s20 = scalar_lea.vmem %s3620_s3, %s2385_s12  ;;  %v2542_v51 = vrot.slane %v2535_v48, %v730_v46  ;;  %v2545_v52 = vrot.slane %v2530_v47, %v730_v46 }
  0x16   : > { %v2401_v8 = vrot.slane %v519_v6, %v2388_v3  ;;  %v2404_v9 = vrot.slane %v519_v6, %v2391_v4  ;;  %v2224_v14 = vmul.f32 -1.442695, %v519_v6  ;;  %s2289_s21 = smov 111   ;;  %v520_v31 = vld [vmem:[%s504_s20] sm:$0x3]  ;;  %vm655_vm6 = vcmp.lt.s32.totalorder %v2548_v53, 16  ;;  %s512_s20 = scalar_lea.vmem %s3631_s14, %s2385_s12 }
  0x17   : > { %v526_v11 = vpack.c.bf16 %v523_v7, %v523_v7  ;;  %v533_v12 = vsel %vm3635_vm0, %v525_v10, 0  ;;  %v2467_v32 = vrot.slane %v520_v31, %v2388_v3  ;;  %v2474_v33 = vrot.slane %v520_v31, %v2391_v4  ;;  %s1885_s27 = sld [smem:[#allocation2]] }
  0x18   : > { %3647 = vst [vmem:[#allocation5_spill] sm:$0xff] %v2401_v8  ;;  %3648 = vst [vmem:[#allocation6_spill] sm:$0xff] %v2404_v9  ;;  %653 = vrot.lane.b32.xlu1 %v2404_v9, %s2282_s25  ;;  %649 = vrot.lane.b32.xlu0 %v2401_v8, %s2282_s25  ;;  %2267 = vpow2.f32 %v2224_v14  ;;  %v739_v57 = vmul.f32 %v2542_v51, %v2404_v9  ;;  %v738_v58 = vmul.f32 %v2545_v52, %v2401_v8 }
  0x19   : > { %2222 = vmatprep.subr.msk.bf16.mxu0 %vm3635_vm0, %v526_v11  ;;  %3649 = vst [vmem:[#allocation7_spill] sm:$0xff] %v2467_v32  ;;  %3650 = vst [vmem:[#allocation8_spill] sm:$0xff] %v2474_v33  ;;  %v2563_v60 = vrot.slane %v2530_v47, %v2388_v3  ;;  %v2567_v61 = vrot.slane %v2535_v48, %v2388_v3  ;;  %v757_v62 = vsub.s32 5, %v2383_v2  ;;  %vm682_vm7 = vcmp.lt.s32.totalorder %v2548_v53, 15 }
  0x1a   : > { %539 = vmatpush1.bf16.msra.mxu0 %v533_v12  ;;  %v2577_v6 = vrot.slane %v2530_v47, %v2391_v4  ;;  %v2581_v7 = vrot.slane %v2535_v48, %v2391_v4  ;;  %v2586_v10 = vrot.slane %v2530_v47, %v716_v56  ;;  %vm3632_vm8 = vcmp.lt.s32.totalorder %v2548_v53, 127 }
  0x1b   : > { %vm804_vm9 = vcmp.lt.s32.totalorder %v2548_v53, 112  ;;  %vm777_vm13 = vcmp.lt.s32.totalorder %v2548_v53, 113 }
  0x1c   : > { %703 = vrot.lane.b32.xlu1 %v2401_v8, %s2283_s28 }
  0x1d   : > { %2223 = vmatmul.mubr.msk.bf16.vlgmr.msra.gmra.mrb[0].mxu0 %vm527_vm1, %v521_v13  ;;  %v2594_v13 = vrot.slane %v2535_v48, %v716_v56  ;;  %vm2698_vm1 = vmand %vm936_vm10, %vm937_vm11  ;;  %vm977_vm11 = vcmask 1047552  }
  0x1e   : > { %1388 = vmatprep.mubr.bf16.mxu0 %v3637_v1  ;;  %vm2729_vm10 = vmand %vm950_vm12, %vm951_vm15  ;;  %vm831_vm12 = vcmp.lt.s32.totalorder %v2548_v53, 111 }
  0x20   : > { %707 = vrot.lane.b32.xlu1 %v2404_v9, %s2283_s28 }
  0x22   : > { %v2268_v15 = vpop.eup %2267 }
  0x23   : > { %v588_v16 = vadd.f32 1.0, %v2268_v15 }
  0x24   : > { %620 = vrot.lane.b32.xlu1 %v2401_v8, %s2284_s29 }
  0x25   : > { %2269 = vrcp.f32 %v588_v16  ;;  %v2603_v16 = vrot.slane %v2535_v48, %v689_v59 }
  0x28   : > { %624 = vrot.lane.b32.xlu1 %v2404_v9, %s2284_s29 }
  0x2c   : > { %676 = vrot.lane.b32.xlu1 %v2401_v8, %s2285_s30 }
  0x2f   : > { %v2270_v17 = vpop.eup %2269 }
  0x30   : > { %680 = vrot.lane.b32.xlu1 %v2404_v9, %s2285_s30  ;;  %v591_v18 = vsub.f32 1.0, %v2270_v17  ;;  %v2606_v17 = vrot.slane %v2530_v47, %v757_v62 }
  0x32   : > { %v596_v20 = vrot.slane %v591_v18, %v2388_v3  ;;  %v600_v23 = vrot.slane %v591_v18, %v2391_v4  ;;  %v2597_v4 = vrot.slane %v2530_v47, %v689_v59 }
  0x34   : > { %744 = vrot.lane.b32.xlu1 %v2401_v8, %s2286_s15 }
  0x38   : > { %748 = vrot.lane.b32.xlu1 %v2404_v9, %s2286_s15 }
  0x3c   : > { %798 = vrot.lane.b32.xlu1 %v2401_v8, %s2287_s16 }
  0x8a   : > { %v654_v34 = vpop.permute.xlu1 %653  ;;  %v650_v41 = vpop.permute.xlu0 %649 }
  0x8b   : > { %v657_v11 = vsel %vm655_vm6, %v650_v41, %v654_v34  ;;  %v659_v12 = vsel %vm655_vm6, %v654_v34, %v650_v41 }
  0x8e   : > { %v704_v35 = vpop.permute.xlu1 %703 }
  0x92   : > { %v708_v36 = vpop.permute.xlu1 %707 }
  0x96   : > { %v621_v37 = vpop.permute.xlu1 %620 }
  0x9a   : > { %v625_v38 = vpop.permute.xlu1 %624 }
  0x9e   : > { %v677_v39 = vpop.permute.xlu1 %676 }
  0xa2   : > { %v681_v40 = vpop.permute.xlu1 %680 }
  0xa6   : > { %v745_v42 = vpop.permute.xlu1 %744 }
  0xaa   : > { %v749_v44 = vpop.permute.xlu1 %748 }
  0xae   : > { %v2537_v49 = vpop.permute.xlu1 %798 }
  0xf0   : > { %v572_v19 = vpop.f32.mrb[0].mxu0 }
  0xf1   : > { %vm579_vm2 = vcmp.gt.f32.partialorder %v572_v19, 0.0  ;;  %v581_v21 = vmul.f32 0.25, %v572_v19  ;;  %v574_v22 = vpop.f32.mrb[1].mxu0 }
  0xf2   : > { %vm580_vm3 = vcmp.gt.f32.partialorder %v574_v22, 0.0  ;;  %v582_v24 = vmul.f32 0.25, %v574_v22  ;;  %v576_v25 = vpop.f32.mrb[2].mxu0 }
  0xf3   : > { %v583_v26 = vsel %vm579_vm2, %v572_v19, %v581_v21  ;;  %v577_v27 = vpop.f32.mrb[3].mxu0  ;;  %v711_v21 = vsel %vm709_vm4, %v704_v35, %v708_v36  ;;  %v713_v25 = vsel %vm709_vm4, %v708_v36, %v704_v35  ;;  %v754_v35 = vsel %vm3632_vm8, %v749_v44, %v745_v42 }
  0xf4   : > { %v2436_v28 = vmul.f32 %v596_v20, %v583_v26  ;;  %v584_v29 = vsel %vm580_vm3, %v574_v22, %v582_v24  ;;  %v2616_v22 = vrot.slane %v2535_v48, %v757_v62  ;;  %v671_v24 = vmul.f32 %v2581_v7, %v657_v11 }
  0xf5   : > { %v2438_v30 = vmul.f32 %v600_v23, %v584_v29  ;;  %v670_v23 = vmul.f32 %v2577_v6, %v659_v12  ;;  %v630_v26 = vsel %vm628_vm5, %v621_v37, %v625_v38  ;;  %v632_v27 = vsel %vm628_vm5, %v625_v38, %v621_v37 }
  0xf6   : > { %647 = vrot.lane.b32.xlu0 %v2436_v28, %s2282_s25  ;;  %v736_v15 = vmul.f32 %v2545_v52, %v2436_v28  ;;  %v686_v29 = vsel %vm682_vm7, %v681_v40, %v677_v39  ;;  %v724_v37 = vmul.f32 %v2586_v10, %v713_v25  ;;  %v725_v38 = vmul.f32 %v2594_v13, %v711_v21 }
  0xf7   : > { %651 = vrot.lane.b32.xlu1 %v2438_v30, %s2282_s25  ;;  %v737_v20 = vmul.f32 %v2542_v51, %v2438_v30  ;;  %v2639_v46 = vmul.f32 %v2563_v60, %v632_v27  ;;  %v2653_v56 = vmul.f32 %v2616_v22, %v754_v35  ;;  %vm963_vm2 = vcmask 1046528  }
  0xf8   : > { %v740_v34 = vpack.c.bf16 %v738_v58, %v736_v15  ;;  %vm964_vm3 = vsmask.f32 6400 }
  0xf9   : > { %vm2764_vm15 = vmand %vm963_vm2, %vm964_vm3  ;;  %vm3633_vm2 = vcmask 1042432  }
  0xfa   : > { %701 = vrot.lane.b32.xlu0 %v2436_v28, %s2283_s28  ;;  %v2655_v59 = vrot.slane %v740_v34, 6 }
  0xfb   : > { %802 = vrot.lane.b32.xlu1 %v2404_v9, %s2287_s16 }
  0xfe   : > { %618 = vrot.lane.b32.xlu0 %v2436_v28, %s2284_s29 }
  0xff   : > { %771 = vrot.lane.b32.xlu1 %v2401_v8, %s2288_s18 }
 0x102   : > { %674 = vrot.lane.b32.xlu0 %v2436_v28, %s2285_s30 }
 0x103   : > { %775 = vrot.lane.b32.xlu1 %v2404_v9, %s2288_s18 }
 0x106   : > { %742 = vrot.lane.b32.xlu0 %v2436_v28, %s2286_s15 }
 0x107   : > { %825 = vrot.lane.b32.xlu1 %v2401_v8, %s2289_s21 }
 0x10a   : > { %796 = vrot.lane.b32.xlu0 %v2436_v28, %s2287_s16 }
 0x10b   : > { %829 = vrot.lane.b32.xlu1 %v2404_v9, %s2289_s21 }
 0x10e   : > { %769 = vrot.lane.b32.xlu0 %v2436_v28, %s2288_s18 }
 0x10f   : > { %1093 = vrot.lane.b32.xlu1 %v2467_v32, %s2282_s25 }
 0x112   : > { %705 = vrot.lane.b32.xlu0 %v2438_v30, %s2283_s28 }
 0x113   : > { %1097 = vrot.lane.b32.xlu1 %v2474_v33, %s2282_s25 }
 0x116   : > { %622 = vrot.lane.b32.xlu0 %v2438_v30, %s2284_s29 }
 0x117   : > { %1129 = vrot.lane.b32.xlu1 %v2467_v32, %s2283_s28 }
 0x11a   : > { %678 = vrot.lane.b32.xlu0 %v2438_v30, %s2285_s30 }
 0x11b   : > { %1133 = vrot.lane.b32.xlu1 %v2474_v33, %s2283_s28 }
 0x11e   : > { %746 = vrot.lane.b32.xlu0 %v2438_v30, %s2286_s15 }
 0x11f   : > { %1075 = vrot.lane.b32.xlu1 %v2467_v32, %s2284_s29 }
 0x122   : > { %800 = vrot.lane.b32.xlu0 %v2438_v30, %s2287_s16 }
 0x123   : > { %1079 = vrot.lane.b32.xlu1 %v2474_v33, %s2284_s29 }
 0x126   : > { %773 = vrot.lane.b32.xlu0 %v2438_v30, %s2288_s18 }
 0x127   : > { %1111 = vrot.lane.b32.xlu1 %v2467_v32, %s2285_s30 }
 0x12a   : > { %823 = vrot.lane.b32.xlu0 %v2436_v28, %s2289_s21  ;;  %v684_v28 = vsel %vm682_vm7, %v677_v39, %v681_v40  ;;  %v811_v39 = vsub.s32 7, %v2383_v2  ;;  %v644_v40 = vmul.f32 %v2567_v61, %v630_v26 }
 0x12b   : > { %1115 = vrot.lane.b32.xlu1 %v2474_v33, %s2285_s30 }
 0x12c   : > { %v2667_v15 = vrot.slane %v2530_v47, %v811_v39 }
 0x12e   : > { %827 = vrot.lane.b32.xlu0 %v2438_v30, %s2289_s21  ;;  %v752_v30 = vsel %vm3632_vm8, %v745_v42, %v749_v44  ;;  %v2647_v42 = vmul.f32 %v2603_v16, %v684_v28 }
 0x12f   : > { %1153 = vrot.lane.b32.xlu1 %v2467_v32, %s2286_s15  ;;  %v2650_v44 = vmul.f32 %v2606_v17, %v752_v30 }
 0x133   : > { %1157 = vrot.lane.b32.xlu1 %v2474_v33, %s2286_s15 }
 0x137   : > { %1189 = vrot.lane.b32.xlu1 %v2467_v32, %s2287_s16 }
 0x13b   : > { %1193 = vrot.lane.b32.xlu1 %v2474_v33, %s2287_s16 }
 0x13f   : > { %1171 = vrot.lane.b32.xlu1 %v2467_v32, %s2288_s18 }
 0x143   : > { %1175 = vrot.lane.b32.xlu1 %v2474_v33, %s2288_s18 }
 0x147   : > { %1207 = vrot.lane.b32.xlu1 %v2467_v32, %s2289_s21 }
 0x14b   : > { %1211 = vrot.lane.b32.xlu1 %v2474_v33, %s2289_s21 }
 0x168   : > { %v648_v43 = vpop.permute.xlu0 %647 }
 0x169   : > { %v652_v55 = vpop.permute.xlu1 %651 }
 0x16a   : > { %v656_v63 = vsel %vm655_vm6, %v648_v43, %v652_v55  ;;  %v658_v3 = vsel %vm655_vm6, %v652_v55, %v648_v43  ;;  %v741_v43 = vpack.c.bf16 %v739_v57, %v737_v20  ;;  %v2644_v55 = vmul.f32 %v2597_v4, %v686_v29 }
 0x16b   : > { %v669_v14 = vmul.f32 %v2581_v7, %v656_v63  ;;  %v668_v18 = vmul.f32 %v2577_v6, %v658_v3 }
 0x16c   : > { %v2524_v45 = vpop.permute.xlu0 %701  ;;  %v2658_v11 = vrot.slane %v741_v43, 6 }
 0x16d   : > { %v673_v31 = vpack.c.bf16 %v671_v24, %v669_v14  ;;  %v672_v36 = vpack.c.bf16 %v670_v23, %v668_v18  ;;  %v2670_v18 = vrot.slane %v2535_v48, %v811_v39  ;;  %v803_v23 = vpop.permute.xlu1 %802  ;;  %v784_v24 = vsub.s32 6, %v2383_v2 }
 0x16f   : > { %v859_v57 = vshrl.u32 %v673_v31, 16  ;;  %v862_v58 = vshll.u32 %v673_v31, 16  ;;  %v851_v63 = vshrl.u32 %v672_v36, 16  ;;  %v854_v3 = vshll.u32 %v672_v36, 16 }
 0x170   : > { %v2539_v50 = vpop.permute.xlu0 %618 }
 0x171   : > { %v861_v25 = vrot.slane %v859_v57, 3  ;;  %v864_v26 = vrot.slane %v862_v58, 4  ;;  %v853_v29 = vrot.slane %v851_v63, 3  ;;  %v856_v30 = vrot.slane %v854_v3, 4  ;;  %v772_v43 = vpop.permute.xlu1 %771 }
 0x172   : > { %v808_v63 = vsel %vm804_vm9, %v803_v23, %v2537_v49 }
 0x174   : > { %v2550_v54 = vpop.permute.xlu0 %674 }
 0x178   : > { %v2572_v5 = vpop.permute.xlu0 %742 }
 0x17c   : > { %v2609_v19 = vpop.permute.xlu0 %796 }
 0x180   : > { %v2634_v41 = vpop.permute.xlu0 %769 }
 0x184   : > { %v706_v62 = vpop.permute.xlu0 %705 }
 0x185   : > { %v710_v12 = vsel %vm709_vm4, %v2524_v45, %v706_v62  ;;  %v712_v14 = vsel %vm709_vm4, %v706_v62, %v2524_v45 }
 0x186   : > { %v722_v20 = vmul.f32 %v2586_v10, %v712_v14  ;;  %v723_v21 = vmul.f32 %v2594_v13, %v710_v12  ;;  %v857_v12 = vor.u32 %v856_v30, %v853_v29 }
 0x188   : > { %v726_v27 = vpack.c.bf16 %v724_v37, %v722_v20  ;;  %v727_v45 = vpack.c.bf16 %v725_v38, %v723_v21  ;;  %v623_v28 = vpop.permute.xlu0 %622  ;;  %v2683_v37 = vrot.slane %v2530_v47, %v784_v24  ;;  %v2686_v38 = vrot.slane %v2535_v48, %v784_v24 }
 0x189   : > { %v629_v31 = vsel %vm628_vm5, %v2539_v50, %v623_v28  ;;  %v631_v34 = vsel %vm628_vm5, %v623_v28, %v2539_v50  ;;  %v806_v50 = vsel %vm804_vm9, %v2537_v49, %v803_v23  ;;  %v865_v47 = vor.u32 %v864_v26, %v861_v25 }
 0x18a   : > { %v881_v35 = vshrl.u32 %v727_v45, 16  ;;  %v884_v36 = vshll.u32 %v727_v45, 16  ;;  %v873_v39 = vshrl.u32 %v726_v27, 16  ;;  %v876_v57 = vshll.u32 %v726_v27, 16 }
 0x18b   : > { %v641_v58 = vmul.f32 %v2563_v60, %v631_v34  ;;  %v642_v62 = vmul.f32 %v2567_v61, %v629_v31  ;;  %v819_v31 = vmul.f32 %v2667_v15, %v806_v50  ;;  %v820_v34 = vmul.f32 %v2670_v18, %v808_v63 }
 0x18c   : > { %v679_v3 = vpop.permute.xlu0 %678  ;;  %v883_v25 = vrot.slane %v881_v35, 2  ;;  %v886_v26 = vrot.slane %v884_v36, 3  ;;  %v875_v28 = vrot.slane %v873_v39, 2  ;;  %v878_v29 = vrot.slane %v876_v57, 3 }
 0x18d   : > { %v683_v14 = vsel %vm682_vm7, %v2550_v54, %v679_v3  ;;  %v685_v20 = vsel %vm682_vm7, %v679_v3, %v2550_v54  ;;  %v646_v21 = vpack.c.bf16 %v644_v40, %v642_v62  ;;  %v645_v49 = vpack.c.bf16 %v2639_v46, %v641_v58  ;;  %v776_v40 = vpop.permute.xlu1 %775 }
 0x18e   : > { %v695_v23 = vmul.f32 %v2597_v4, %v685_v20  ;;  %v696_v24 = vmul.f32 %v2603_v16, %v683_v14  ;;  %v779_v62 = vsel %vm777_vm13, %v772_v43, %v776_v40  ;;  %v781_v50 = vsel %vm777_vm13, %v776_v40, %v772_v43 }
 0x18f   : > { %v940_v27 = vsel %vm2698_vm1, %v646_v21, %v865_v47  ;;  %v939_v45 = vsel %vm2698_vm1, %v645_v49, %v857_v12  ;;  %v879_v63 = vor.u32 %v878_v29, %v875_v28  ;;  %v792_v28 = vmul.f32 %v2683_v37, %v779_v62 }
 0x190   : > { %v699_v30 = vpack.c.bf16 %v2644_v55, %v695_v23  ;;  %v700_v54 = vpack.c.bf16 %v2647_v42, %v696_v24  ;;  %1006 = vmatprep.subr.bf16.mxu1 %v940_v27  ;;  %v747_v46 = vpop.permute.xlu0 %746 }
 0x191   : > { %v751_v35 = vsel %vm3632_vm8, %v2572_v5, %v747_v46  ;;  %v753_v36 = vsel %vm3632_vm8, %v747_v46, %v2572_v5  ;;  %1007 = vmatpush1.bf16.msra.mxu1 %v939_v45  ;;  %v887_v5 = vor.u32 %v886_v26, %v883_v25  ;;  %vm978_vm8 = vsmask.f32 7424  ;;  %v826_v26 = vpop.permute.xlu1 %825 }
 0x192   : > { %v870_v55 = vrot.slane %v699_v30, 7  ;;  %v871_v42 = vrot.slane %v700_v54, 7  ;;  %v763_v39 = vmul.f32 %v2606_v17, %v751_v35  ;;  %v764_v57 = vmul.f32 %v2616_v22, %v753_v36  ;;  %vm2780_vm3 = vmand %vm977_vm11, %vm978_vm8 }
 0x193   : > { %vm3634_vm8 = vcmask 1043456   ;;  %vm996_vm11 = vcmask 662528  }
 0x194   : > { %v767_v3 = vpack.c.bf16 %v2650_v44, %v763_v39  ;;  %v768_v14 = vpack.c.bf16 %v2653_v56, %v764_v57  ;;  %v801_v20 = vpop.permute.xlu0 %800  ;;  %v948_v21 = vsel %vm941_vm14, %v865_v47, %v871_v42  ;;  %v944_v49 = vsel %vm941_vm14, %v857_v12, %v870_v55 }
 0x195   : > { %v805_v23 = vsel %vm804_vm9, %v2609_v19, %v801_v20  ;;  %v807_v43 = vsel %vm804_vm9, %v801_v20, %v2609_v19  ;;  %v954_v44 = vsel %vm2729_vm10, %v948_v21, %v887_v5  ;;  %v953_v56 = vsel %vm2729_vm10, %v944_v49, %v879_v63 }
 0x196   : > { %v895_v24 = vshrl.u32 %v767_v3, 16  ;;  %v898_v47 = vshll.u32 %v767_v3, 16  ;;  %v903_v25 = vshrl.u32 %v768_v14, 16  ;;  %v906_v12 = vshll.u32 %v768_v14, 16  ;;  %1008 = vmatprep.subr.bf16.mxu1 %v954_v44 }
 0x197   : > { %v817_v27 = vmul.f32 %v2667_v15, %v805_v23  ;;  %v818_v45 = vmul.f32 %v2670_v18, %v807_v43  ;;  %v793_v19 = vmul.f32 %v2686_v38, %v781_v50  ;;  %1009 = vmatpush1.bf16.msra.mxu1 %v953_v56  ;;  %v961_v50 = vsel %vm3635_vm0, %v887_v5, %v2658_v11  ;;  %v830_v23 = vpop.permute.xlu1 %829  ;;  %v2787_v11 = vld [vmem:[%s3617_s0 + $0x10] ss:$0 sm:$0xff]  ;;  %v2792_v5 = vld [vmem:[%s3617_s0 + $0x18] ss:$0 sm:$0xff] }
 0x198   : > { %v774_v29 = vpop.permute.xlu0 %773  ;;  %v905_v30 = vrot.slane %v903_v25, 1  ;;  %v908_v54 = vrot.slane %v906_v12, 2  ;;  %v897_v46 = vrot.slane %v895_v24, 1  ;;  %v900_v40 = vrot.slane %v898_v47, 2 }
 0x199   : > { %v821_v35 = vpack.c.bf16 %v819_v31, %v817_v27  ;;  %v822_v36 = vpack.c.bf16 %v820_v34, %v818_v45  ;;  %v778_v55 = vsel %vm777_vm13, %v2634_v41, %v774_v29  ;;  %v780_v42 = vsel %vm777_vm13, %v774_v29, %v2634_v41 }
 0x19a   : > { %v790_v57 = vmul.f32 %v2683_v37, %v778_v55  ;;  %v791_v62 = vmul.f32 %v2686_v38, %v780_v42  ;;  %v909_v31 = vor.u32 %v908_v54, %v905_v30  ;;  %v901_v34 = vor.u32 %v900_v40, %v897_v46 }
 0x19b   : > { %v957_v3 = vsel %vm3635_vm0, %v879_v63, %v2655_v59  ;;  %v921_v14 = vshll.u32 %v822_v36, 16  ;;  %v917_v41 = vshll.u32 %v821_v35, 16  ;;  %v833_v63 = vsel %vm831_vm12, %v826_v26, %v830_v23 }
 0x19c   : > { %v794_v20 = vpack.c.bf16 %v792_v28, %v790_v57  ;;  %v795_v21 = vpack.c.bf16 %v793_v19, %v791_v62  ;;  %v824_v49 = vpop.permute.xlu0 %823  ;;  %v967_v43 = vsel %vm2764_vm15, %v961_v50, %v909_v31  ;;  %v966_v44 = vsel %vm2764_vm15, %v957_v3, %v901_v34 }
 0x19d   : > { %1010 = vmatprep.subr.bf16.mxu1 %v967_v43  ;;  %v835_v47 = vsel %vm831_vm12, %v830_v23, %v826_v26  ;;  %v923_v25 = vrot.slane %v921_v14, 1  ;;  %v919_v12 = vrot.slane %v917_v41, 1  ;;  %v846_v26 = vmul.f32 %v2787_v11, %v833_v63 }
 0x19e   : > { %v914_v56 = vrot.slane %v794_v20, 5  ;;  %v915_v24 = vrot.slane %v795_v21, 5  ;;  %1011 = vmatpush1.bf16.msra.mxu1 %v966_v44  ;;  %v847_v46 = vmul.f32 %v2792_v5, %v835_v47  ;;  %v927_v62 = vshrl.u32 %v822_v36, 16  ;;  %v2262_v36 = vld [vmem:[%s3622_s5] sm:$0xff]  }
 0x1a0   : > { %v828_v27 = vpop.permute.xlu0 %827  ;;  %v975_v45 = vsel %vm3633_vm2, %v909_v31, %v915_v24  ;;  %v971_v28 = vsel %vm3633_vm2, %v901_v34, %v914_v56  ;;  %v924_v31 = vshrl.u32 %v821_v35, 16  ;;  %v2814_v34 = vsel %vm941_vm14, 65535, %v3637_v1 }
 0x1a1   : > { %v832_v19 = vsel %vm831_vm12, %v824_v49, %v828_v27  ;;  %v834_v29 = vsel %vm831_vm12, %v828_v27, %v824_v49  ;;  %v981_v30 = vsel %vm2780_vm3, %v975_v45, %v923_v25  ;;  %v980_v54 = vsel %vm2780_vm3, %v971_v28, %v919_v12 }
 0x1a2   : > { %v844_v40 = vmul.f32 %v2787_v11, %v832_v19  ;;  %v845_v55 = vmul.f32 %v2792_v5, %v834_v29  ;;  %1012 = vmatprep.subr.bf16.mxu1 %v981_v30  ;;  %v929_v14 = vor.u32 %v927_v62, %v923_v25  ;;  %v926_v41 = vor.u32 %v924_v31, %v919_v12  ;;  %v1094_v19 = vpop.permute.xlu1 %1093 }
 0x1a3   : > { %1013 = vmatpush1.bf16.msra.mxu1 %v980_v54 }
 0x1a4   : > { %v848_v42 = vpack.c.bf16 %v846_v26, %v844_v40  ;;  %v849_v57 = vpack.c.bf16 %v847_v46, %v845_v55 }
 0x1a6   : > { %v934_v50 = vrot.slane %v848_v42, 4  ;;  %v935_v3 = vrot.slane %v849_v57, 4  ;;  %v1098_v29 = vpop.permute.xlu1 %1097 }
 0x1a8   : > { %v989_v20 = vsel %vm3634_vm8, %v929_v14, %v935_v3  ;;  %v985_v21 = vsel %vm3634_vm8, %v926_v41, %v934_v50  ;;  %v1004_v49 = vand.u32 %v2814_v34, %v935_v3  ;;  %v1002_v35 = vand.u32 %v2814_v34, %v934_v50 }
 0x1a9   : > { %1014 = vmatprep.subr.bf16.mxu1 %v989_v20 }
 0x1aa   : > { %1015 = vmatpush1.bf16.msra.mxu1 %v985_v21  ;;  %v1130_v30 = vpop.permute.xlu1 %1129 }
 0x1ab   : > { %1016 = vmatprep.subr.bf16.mxu1 %v1004_v49 }
 0x1ae   : > { %1017 = vmatpush1.bf16.msra.mxu1 %v1002_v35  ;;  %v1134_v54 = vpop.permute.xlu1 %1133  ;;  %v1100_v35 = vsel %vm655_vm6, %v1094_v19, %v1098_v29 }
 0x1b1   : > { %2228 = vmatmul.mubr.msk.bf16.vlgmr.msra.gmra.mrb[0].mxu1 %vm996_vm11, %v2262_v36  ;;  %v1102_v36 = vsel %vm655_vm6, %v1098_v29, %v1094_v19  ;;  %v1106_v29 = vmul.f32 %v1100_v35, %v2581_v7 }
 0x1b2   : > { %v1076_v26 = vpop.permute.xlu1 %1075  ;;  %v1105_v19 = vmul.f32 %v1102_v36, %v2577_v6 }
 0x1b6   : > { %v1080_v46 = vpop.permute.xlu1 %1079 }
 0x1ba   : > { %v1112_v40 = vpop.permute.xlu1 %1111 }
 0x1be   : > { %v1116_v42 = vpop.permute.xlu1 %1115 }
 0x1bf   : > { %v1120_v36 = vsel %vm682_vm7, %v1116_v42, %v1112_v40 }
 0x1c2   : > { %v1154_v62 = vpop.permute.xlu1 %1153 }
 0x1c6   : > { %v1158_v3 = vpop.permute.xlu1 %1157 }
 0x1ca   : > { %v1190_v41 = vpop.permute.xlu1 %1189 }
 0x1ce   : > { %v1194_v49 = vpop.permute.xlu1 %1193 }
 0x1d2   : > { %v2938_v35 = vpop.permute.xlu1 %1171 }
 0x284   : > { %v1040_v23 = vpop.f32.mrb[0].mxu1 }
 0x285   : > { %vm1049_vm2 = vcmp.gt.f32.partialorder %v1040_v23, 0.0  ;;  %v1053_v43 = vmul.f32 0.25, %v1040_v23  ;;  %v1042_v44 = vpop.f32.mrb[1].mxu1 }
 0x286   : > { %v1044_v56 = vpop.f32.mrb[2].mxu1  ;;  %v1054_v63 = vmul.f32 0.25, %v1042_v44  ;;  %vm1050_vm0 = vcmp.gt.f32.partialorder %v1042_v44, 0.0 }
 0x287   : > { %v2824_v24 = vsel %vm1049_vm2, %v1040_v23, %v1053_v43  ;;  %vm1051_vm8 = vcmp.gt.f32.partialorder %v1044_v56, 0.0  ;;  %v1055_v47 = vmul.f32 0.25, %v1044_v56  ;;  %v1046_v25 = vpop.f32.mrb[3].mxu1  ;;  %v1136_v23 = vsel %vm709_vm4, %v1130_v30, %v1134_v54 }
 0x288   : > { %3659 = vst [vmem:[#allocation9_spill] sm:$0xff] %v2824_v24  ;;  %1406 = vrot.lane.b32.xlu1 %v2824_v24, %s2284_s29  ;;  %v2832_v27 = vsel %vm1050_vm0, %v1042_v44, %v1054_v63  ;;  %v1056_v45 = vmul.f32 0.25, %v1046_v25  ;;  %vm1052_vm0 = vcmp.gt.f32.partialorder %v1046_v25, 0.0  ;;  %v1138_v43 = vsel %vm709_vm4, %v1134_v54, %v1130_v30 }
 0x289   : > { %v2828_v12 = vsel %vm1051_vm8, %v1044_v56, %v1055_v47  ;;  %3660 = vst [vmem:[#allocation10_spill] sm:$0xff] %v2832_v27  ;;  %v1084_v44 = vsel %vm628_vm5, %v1080_v46, %v1076_v26  ;;  %v1082_v63 = vsel %vm628_vm5, %v1076_v26, %v1080_v46  ;;  %v1141_v26 = vmul.f32 %v1138_v43, %v2586_v10 }
 0x28a   : > { %1091 = vrot.lane.b32.xlu0 %v2828_v12, %s2282_s25  ;;  %v2860_v28 = vsel %vm1052_vm0, %v1046_v25, %v1056_v45  ;;  %v2922_v45 = vmul.f32 %v2467_v32, %v2545_v52  ;;  %v1142_v46 = vmul.f32 %v1136_v23, %v2594_v13  ;;  %v1087_v0 = vmul.f32 %v1084_v44, %v2563_v60 }
 0x28b   : > { %v1118_v43 = vsel %vm682_vm7, %v1112_v40, %v1116_v42  ;;  %vm3661_vm2 = vcmp.lt.s32.totalorder %v2548_v53, 127 }
 0x28c   : > { %1410 = vrot.lane.b32.xlu1 %v2832_v27, %s2284_s29  ;;  %v1160_v23 = vsel %vm3661_vm2, %v1154_v62, %v1158_v3  ;;  %vm3662_vm8 = vmmov %vm3661_vm2 }
 0x28d   : > { %vm3663_vm0 = vmmov %vm3661_vm2 }
 0x28e   : > { %1127 = vrot.lane.b32.xlu0 %v2828_v12, %s2283_s28  ;;  %vm3664_vm2 = vmmov %vm3663_vm0 }
 0x290   : > { %1424 = vrot.lane.b32.xlu1 %v2824_v24, %s2282_s25 }
 0x292   : > { %1073 = vrot.lane.b32.xlu0 %v2828_v12, %s2284_s29 }
 0x294   : > { %1428 = vrot.lane.b32.xlu1 %v2832_v27, %s2282_s25 }
 0x296   : > { %1109 = vrot.lane.b32.xlu0 %v2828_v12, %s2285_s30 }
 0x298   : > { %1442 = vrot.lane.b32.xlu1 %v2824_v24, %s2285_s30 }
 0x29a   : > { %1151 = vrot.lane.b32.xlu0 %v2828_v12, %s2286_s15 }
 0x29c   : > { %1446 = vrot.lane.b32.xlu1 %v2832_v27, %s2285_s30 }
 0x29e   : > { %1187 = vrot.lane.b32.xlu0 %v2828_v12, %s2287_s16 }
 0x2a0   : > { %1460 = vrot.lane.b32.xlu1 %v2824_v24, %s2283_s28 }
 0x2a2   : > { %1169 = vrot.lane.b32.xlu0 %v2828_v12, %s2288_s18 }
 0x2a4   : > { %1464 = vrot.lane.b32.xlu1 %v2832_v27, %s2283_s28 }
 0x2a6   : > { %1095 = vrot.lane.b32.xlu0 %v2860_v28, %s2282_s25 }
 0x2a8   : > { %1484 = vrot.lane.b32.xlu1 %v2824_v24, %s2286_s15 }
 0x2aa   : > { %1131 = vrot.lane.b32.xlu0 %v2860_v28, %s2283_s28 }
 0x2ac   : > { %1488 = vrot.lane.b32.xlu1 %v2832_v27, %s2286_s15 }
 0x2ae   : > { %1077 = vrot.lane.b32.xlu0 %v2860_v28, %s2284_s29 }
 0x2b0   : > { %1502 = vrot.lane.b32.xlu1 %v2824_v24, %s2288_s18 }
 0x2b2   : > { %1113 = vrot.lane.b32.xlu0 %v2860_v28, %s2285_s30 }
 0x2b4   : > { %1506 = vrot.lane.b32.xlu1 %v2832_v27, %s2288_s18 }
 0x2b6   : > { %1155 = vrot.lane.b32.xlu0 %v2860_v28, %s2286_s15 }
 0x2b8   : > { %1520 = vrot.lane.b32.xlu1 %v2824_v24, %s2287_s16 }
 0x2ba   : > { %1191 = vrot.lane.b32.xlu0 %v2860_v28, %s2287_s16 }
 0x2bc   : > { %1524 = vrot.lane.b32.xlu1 %v2832_v27, %s2287_s16 }
 0x2be   : > { %1173 = vrot.lane.b32.xlu0 %v2860_v28, %s2288_s18 }
 0x2c0   : > { %1538 = vrot.lane.b32.xlu1 %v2824_v24, %s2289_s21 }
 0x2c2   : > { %1205 = vrot.lane.b32.xlu0 %v2828_v12, %s2289_s21 }
 0x2c4   : > { %1542 = vrot.lane.b32.xlu1 %v2832_v27, %s2289_s21 }
 0x2c6   : > { %1209 = vrot.lane.b32.xlu0 %v2860_v28, %s2289_s21 }
 0x2fc   : > { %v1092_v55 = vpop.permute.xlu0 %1091 }
 0x300   : > { %v1128_v57 = vpop.permute.xlu0 %1127 }
 0x304   : > { %v1074_v31 = vpop.permute.xlu0 %1073 }
 0x308   : > { %v2896_v50 = vpop.permute.xlu0 %1109 }
 0x30c   : > { %v2898_v14 = vpop.permute.xlu0 %1151 }
 0x310   : > { %v2900_v20 = vpop.permute.xlu0 %1187 }
 0x314   : > { %v2902_v21 = vpop.permute.xlu0 %1169 }
 0x318   : > { %v1096_v56 = vpop.permute.xlu0 %1095 }
 0x319   : > { %v1099_v47 = vsel %vm655_vm6, %v1092_v55, %v1096_v56  ;;  %v1101_v25 = vsel %vm655_vm6, %v1096_v56, %v1092_v55  ;;  %v2933_v55 = vmul.f32 %v2474_v33, %v2542_v51  ;;  %v1088_v56 = vmul.f32 %v1082_v63, %v2567_v61 }
 0x31a   : > { %v1103_v30 = vmul.f32 %v1101_v25, %v2577_v6  ;;  %v1104_v54 = vmul.f32 %v1099_v47, %v2581_v7 }
 0x31c   : > { %v1107_v25 = vpack.c.bf16 %v1105_v19, %v1103_v30  ;;  %v1108_v1 = vpack.c.bf16 %v1106_v29, %v1104_v54  ;;  %v1132_v47 = vpop.permute.xlu0 %1131  ;;  %v1123_v19 = vmul.f32 %v1120_v36, %v2597_v4  ;;  %v1162_v29 = vsel %vm3662_vm8, %v1158_v3, %v1154_v62  ;;  %v1176_v3 = vpop.permute.xlu1 %1175 }
 0x31d   : > { %v1135_v44 = vsel %vm709_vm4, %v1128_v57, %v1132_v47  ;;  %v1137_v63 = vsel %vm709_vm4, %v1132_v47, %v1128_v57  ;;  %v1124_v30 = vmul.f32 %v1118_v43, %v2603_v16  ;;  %v1165_v54 = vmul.f32 %v1160_v23, %v2606_v17 }
 0x31e   : > { %v1224_v33 = vshrl.u32 %v1107_v25, 16  ;;  %v1227_v32 = vshll.u32 %v1107_v25, 16  ;;  %v1232_v9 = vshrl.u32 %v1108_v1, 16  ;;  %v1235_v2 = vshll.u32 %v1108_v1, 16 }
 0x31f   : > { %v1139_v40 = vmul.f32 %v1137_v63, %v2586_v10  ;;  %v1140_v42 = vmul.f32 %v1135_v44, %v2594_v13  ;;  %v1166_v36 = vmul.f32 %v1162_v29, %v2616_v22  ;;  %v1196_v62 = vsel %vm804_vm9, %v1190_v41, %v1194_v49 }
 0x320   : > { %v1226_v8 = vrot.slane %v1224_v33, 3  ;;  %v1229_v24 = vrot.slane %v1227_v32, 4  ;;  %v1078_v57 = vpop.permute.xlu0 %1077  ;;  %v1234_v47 = vrot.slane %v1232_v9, 3  ;;  %v1237_v25 = vrot.slane %v1235_v2, 4 }
 0x321   : > { %v1143_v27 = vpack.c.bf16 %v1141_v26, %v1139_v40  ;;  %v1144_v1 = vpack.c.bf16 %v1142_v46, %v1140_v42  ;;  %v1081_v44 = vsel %vm628_vm5, %v1074_v31, %v1078_v57  ;;  %v1083_v43 = vsel %vm628_vm5, %v1078_v57, %v1074_v31 }
 0x322   : > { %v1198_v32 = vsel %vm804_vm9, %v1194_v49, %v1190_v41  ;;  %v1178_v2 = vsel %vm777_vm13, %v2938_v35, %v1176_v3  ;;  %v1085_v23 = vmul.f32 %v1083_v43, %v2563_v60  ;;  %v1086_v63 = vmul.f32 %v1081_v44, %v2567_v61 }
 0x323   : > { %v1246_v9 = vshrl.u32 %v1143_v27, 16  ;;  %v1249_v33 = vshll.u32 %v1143_v27, 16  ;;  %v1254_v26 = vshrl.u32 %v1144_v1, 16  ;;  %v1257_v46 = vshll.u32 %v1144_v1, 16 }
 0x324   : > { %v1114_v29 = vpop.permute.xlu0 %1113  ;;  %v1238_v40 = vor.u32 %v1237_v25, %v1234_v47  ;;  %v1230_v42 = vor.u32 %v1229_v24, %v1226_v8  ;;  %v2971_v31 = vmul.f32 %v2860_v28, %v2542_v51  ;;  %v2975_v41 = vmul.f32 %v2828_v12, %v2545_v52 }
 0x325   : > { %v1089_v49 = vpack.c.bf16 %v1087_v0, %v1085_v23  ;;  %v1090_v57 = vpack.c.bf16 %v1088_v56, %v1086_v63  ;;  %v1117_v27 = vsel %vm682_vm7, %v2896_v50, %v1114_v29  ;;  %v1119_v1 = vsel %vm682_vm7, %v1114_v29, %v2896_v50 }
 0x326   : > { %v1248_v47 = vrot.slane %v1246_v9, 2  ;;  %v1251_v8 = vrot.slane %v1249_v33, 3  ;;  %v1121_v24 = vmul.f32 %v1119_v1, %v2597_v4  ;;  %v1122_v28 = vmul.f32 %v1117_v27, %v2603_v16 }
 0x327   : > { %v1256_v25 = vrot.slane %v1254_v26, 2  ;;  %v1259_v44 = vrot.slane %v1257_v46, 3  ;;  %v1310_v0 = vsel %vm2698_vm1, %v1090_v57, %v1238_v40  ;;  %v1309_v12 = vsel %vm2698_vm1, %v1089_v49, %v1230_v42  ;;  %v1208_v46 = vpop.permute.xlu1 %1207 }
 0x328   : > { %v1156_v56 = vpop.permute.xlu0 %1155  ;;  %v1125_v43 = vpack.c.bf16 %v1123_v19, %v1121_v24  ;;  %v1126_v23 = vpack.c.bf16 %v1124_v30, %v1122_v28  ;;  %1356 = vmatprep.subr.bf16.mxu0 %v1310_v0  ;;  %v1201_v33 = vmul.f32 %v1196_v62, %v2667_v15  ;;  %v1202_v26 = vmul.f32 %v1198_v32, %v2670_v18 }
 0x329   : > { %v1159_v50 = vsel %vm3663_vm0, %v2898_v14, %v1156_v56  ;;  %v1161_v9 = vsel %vm3664_vm2, %v1156_v56, %v2898_v14  ;;  %1357 = vmatpush1.bf16.msra.mxu0 %v1309_v12  ;;  %v1180_v30 = vsel %vm777_vm13, %v1176_v3, %v2938_v35  ;;  %v1183_v63 = vmul.f32 %v1178_v2, %v2683_v37 }
 0x32a   : > { %v1163_v48 = vmul.f32 %v1159_v50, %v2606_v17  ;;  %v1164_v19 = vmul.f32 %v1161_v9, %v2616_v22  ;;  %v1243_v29 = vrot.slane %v1125_v43, 7  ;;  %v1244_v49 = vrot.slane %v1126_v23, 7 }
 0x32b   : > { %v1150_v62 = vpack.c.bf16 %v2933_v55, %v2971_v31  ;;  %v1149_v32 = vpack.c.bf16 %v2922_v45, %v2975_v41  ;;  %v1260_v3 = vor.u32 %v1259_v44, %v1256_v25  ;;  %v1252_v2 = vor.u32 %v1251_v8, %v1248_v47  ;;  %v1212_v41 = vpop.permute.xlu1 %1211 }
 0x32c   : > { %v1167_v57 = vpack.c.bf16 %v1165_v54, %v1163_v48  ;;  %v1168_v14 = vpack.c.bf16 %v1166_v36, %v1164_v19  ;;  %v1192_v27 = vpop.permute.xlu0 %1191  ;;  %v1317_v45 = vsel %vm941_vm14, %v1238_v40, %v1244_v49  ;;  %v1313_v31 = vsel %vm941_vm14, %v1230_v42, %v1243_v29 }
 0x32d   : > { %v1195_v1 = vsel %vm804_vm9, %v2900_v20, %v1192_v27  ;;  %v1197_v35 = vsel %vm804_vm9, %v1192_v27, %v2900_v20  ;;  %v1184_v47 = vmul.f32 %v1180_v30, %v2686_v38  ;;  %v1214_v8 = vsel %vm831_vm12, %v1208_v46, %v1212_v41 }
 0x32e   : > { %v1268_v24 = vshrl.u32 %v1167_v57, 16  ;;  %v1271_v54 = vshll.u32 %v1167_v57, 16  ;;  %v1276_v36 = vshrl.u32 %v1168_v14, 16  ;;  %v1279_v28 = vshll.u32 %v1168_v14, 16 }
 0x32f   : > { %v1199_v0 = vmul.f32 %v1195_v1, %v2667_v15  ;;  %v1200_v55 = vmul.f32 %v1197_v35, %v2670_v18  ;;  %v1320_v50 = vsel %vm2729_vm10, %v1317_v45, %v1260_v3  ;;  %v1319_v40 = vsel %vm2729_vm10, %v1313_v31, %v1252_v2 }
 0x330   : > { %v1270_v12 = vrot.slane %v1268_v24, 1  ;;  %v1273_v56 = vrot.slane %v1271_v54, 2  ;;  %v1278_v43 = vrot.slane %v1276_v36, 1  ;;  %v1281_v23 = vrot.slane %v1279_v28, 2  ;;  %v1174_v20 = vpop.permute.xlu0 %1173  ;;  %1358 = vmatprep.subr.bf16.mxu0 %v1320_v50 }
 0x331   : > { %v1203_v25 = vpack.c.bf16 %v1201_v33, %v1199_v0  ;;  %v1204_v44 = vpack.c.bf16 %v1202_v26, %v1200_v55  ;;  %v1177_v42 = vsel %vm777_vm13, %v2902_v21, %v1174_v20  ;;  %v1179_v9 = vsel %vm777_vm13, %v1174_v20, %v2902_v21  ;;  %1359 = vmatpush1.bf16.msra.mxu0 %v1319_v40 }
 0x332   : > { %v1216_v48 = vsel %vm831_vm12, %v1212_v41, %v1208_v46  ;;  %v1181_v33 = vmul.f32 %v1177_v42, %v2683_v37  ;;  %v1266_v26 = vrot.slane %v1150_v62, 6  ;;  %v1265_v19 = vrot.slane %v1149_v32, 6 }
 0x333   : > { %v1290_v30 = vshll.u32 %v1203_v25, 16  ;;  %v1182_v58 = vmul.f32 %v1179_v9, %v2686_v38  ;;  %v1282_v49 = vor.u32 %v1281_v23, %v1278_v43  ;;  %v1274_v57 = vor.u32 %v1273_v56, %v1270_v12 }
 0x334   : > { %v1206_v29 = vpop.permute.xlu0 %1205  ;;  %v1185_v14 = vpack.c.bf16 %v1183_v63, %v1181_v33  ;;  %vm3665_vm14 = vcmask 1041408   ;;  %v1294_v1 = vshll.u32 %v1204_v44, 16  ;;  %v1219_v24 = vmul.f32 %v2787_v11, %v1214_v8 }
 0x335   : > { %v1327_v27 = vsel %vm3665_vm14, %v1260_v3, %v1266_v26  ;;  %vm3666_vm1 = vmmov %vm3665_vm14  ;;  %v1186_v35 = vpack.c.bf16 %v1184_v47, %v1182_v58  ;;  %v1220_v54 = vmul.f32 %v2792_v5, %v1216_v48  ;;  %v1292_v36 = vrot.slane %v1290_v30, 1 }
 0x336   : > { %v1323_v21 = vsel %vm3666_vm1, %v1252_v2, %v1265_v19  ;;  %v1330_v46 = vsel %vm2764_vm15, %v1327_v27, %v1282_v49  ;;  %v1287_v32 = vrot.slane %v1185_v14, 5  ;;  %v1296_v0 = vrot.slane %v1294_v1, 1  ;;  %v1407_v14 = vpop.permute.xlu1 %1406 }
 0x337   : > { %v1329_v62 = vsel %vm2764_vm15, %v1323_v21, %v1274_v57  ;;  %1360 = vmatprep.subr.bf16.mxu0 %v1330_v46  ;;  %v1288_v63 = vrot.slane %v1186_v35, 5  ;;  %vm3667_vm10 = vcmask 1042432   ;;  %v1297_v56 = vshrl.u32 %v1203_v25, 16  ;;  %v1061_v25 = vld [vmem:[%s3623_s6] sm:$0xf] }
 0x338   : > { %1361 = vmatpush1.bf16.msra.mxu0 %v1329_v62  ;;  %v1210_v3 = vpop.permute.xlu0 %1209  ;;  %v1333_v39 = vsel %vm3667_vm10, %v1274_v57, %v1287_v32  ;;  %vm3668_vm15 = vmmov %vm3667_vm10  ;;  %v1300_v43 = vshrl.u32 %v1204_v44, 16  ;;  %vm3669_vm8 = vcmask 1043456   ;;  %vm1560_vm2 = vcmask 130048  }
 0x339   : > { %v1213_v2 = vsel %vm831_vm12, %v1206_v29, %v1210_v3  ;;  %v1215_v28 = vsel %vm831_vm12, %v1210_v3, %v1206_v29  ;;  %v1337_v31 = vsel %vm3668_vm15, %v1282_v49, %v1288_v63  ;;  %v1339_v41 = vsel %vm2780_vm3, %v1333_v39, %v1292_v36  ;;  %vm3670_vm0 = vmmov %vm3669_vm8  ;;  %v3097_v49 = vld [vmem:[%s3624_s7] sm:$0xff] }
 0x33a   : > { %v1217_v55 = vmul.f32 %v2787_v11, %v1213_v2  ;;  %v1218_v45 = vmul.f32 %v2792_v5, %v1215_v28  ;;  %v1340_v12 = vsel %vm2780_vm3, %v1337_v31, %v1296_v0  ;;  %v1302_v50 = vor.u32 %v1300_v43, %v1296_v0  ;;  %v1411_v27 = vpop.permute.xlu1 %1410 }
 0x33b   : > { %1362 = vmatprep.subr.bf16.mxu0 %v1340_v12  ;;  %v1299_v40 = vor.u32 %v1297_v56, %v1292_v36  ;;  %v2231_v57 = vcombine.high %v3097_v49, %v3097_v49  ;;  %v1413_v31 = vsel %vm628_vm5, %v1407_v14, %v1411_v27  ;;  %vm3672_vm14 = vcmp.lt.s32.totalorder %v2548_v53, 127 }
 0x33c   : > { %v1221_v23 = vpack.c.bf16 %v1219_v24, %v1217_v55  ;;  %v1222_v20 = vpack.c.bf16 %v1220_v54, %v1218_v45  ;;  %1363 = vmatpush1.bf16.msra.mxu0 %v1339_v41  ;;  %v1415_v55 = vsel %vm628_vm5, %v1411_v27, %v1407_v14  ;;  %vm3673_vm1 = vmmov %vm3672_vm14 }
 0x33d   : > { %2232 = vmatprep.mubr.msk.bf16.mxu1 %vm1560_vm2, %v2231_v57  ;;  %v1418_v12 = vmul.f32 %v1415_v55, %v2563_v60  ;;  %vm3675_vm10 = vmmov %vm3673_vm1 }
 0x33e   : > { %v1307_v47 = vrot.slane %v1221_v23, 4  ;;  %v1308_v8 = vrot.slane %v1222_v20, 4  ;;  %v1425_v21 = vpop.permute.xlu1 %1424  ;;  %v1419_v23 = vmul.f32 %v1413_v31, %v2567_v61  ;;  %vm3676_vm15 = vmmov %vm3673_vm1 }
 0x340   : > { %v1347_v42 = vsel %vm3669_vm8, %v1302_v50, %v1308_v8  ;;  %v1343_v9 = vsel %vm3670_vm0, %v1299_v40, %v1307_v47  ;;  %v1354_v48 = vand.u32 %v1308_v8, %v2814_v34  ;;  %v1352_v59 = vand.u32 %v1307_v47, %v2814_v34 }
 0x341   : > { %1364 = vmatprep.subr.bf16.mxu0 %v1347_v42 }
 0x342   : > { %1365 = vmatpush1.bf16.msra.mxu0 %v1343_v9  ;;  %v1429_v1 = vpop.permute.xlu1 %1428 }
 0x343   : > { %1366 = vmatprep.subr.bf16.mxu0 %v1354_v48  ;;  %v1433_v20 = vsel %vm655_vm6, %v1429_v1, %v1425_v21  ;;  %v1431_v50 = vsel %vm655_vm6, %v1425_v21, %v1429_v1 }
 0x346   : > { %1367 = vmatpush1.bf16.msra.mxu0 %v1352_v59  ;;  %v1443_v35 = vpop.permute.xlu1 %1442  ;;  %v1436_v59 = vmul.f32 %v1433_v20, %v2577_v6 }
 0x349   : > { %2229 = vmatmul.mubr.msk.bf16.vlgmr.msra.gmra.mrb[4].mxu0 %vm996_vm11, %v1061_v25 }
 0x34a   : > { %v1447_v46 = vpop.permute.xlu1 %1446 }
 0x34e   : > { %v1461_v32 = vpop.permute.xlu1 %1460 }
 0x352   : > { %v1465_v54 = vpop.permute.xlu1 %1464 }
 0x353   : > { %v1469_v55 = vsel %vm709_vm4, %v1465_v54, %v1461_v32 }
 0x356   : > { %v3106_v3 = vpop.permute.xlu1 %1484 }
 0x35a   : > { %v3110_v28 = vpop.permute.xlu1 %1488 }
 0x35e   : > { %v3118_v45 = vpop.permute.xlu1 %1502 }
 0x362   : > { %v3138_v40 = vpop.permute.xlu1 %1506 }
 0x41c   : > { %v1390_v44 = vpop.f32.mrb[4].mxu0 }
 0x41d   : > { %vm1397_vm3 = vcmp.gt.f32.partialorder %v1390_v44, 0.0  ;;  %v1399_v33 = vmul.f32 0.25, %v1390_v44  ;;  %v1392_v26 = vpop.f32.mrb[5].mxu0 }
 0x41e   : > { %v1394_v19 = vpop.f32.mrb[6].mxu0  ;;  %v1400_v34 = vmul.f32 0.25, %v1392_v26  ;;  %vm1398_vm11 = vcmp.gt.f32.partialorder %v1392_v26, 0.0 }
 0x41f   : > { %v3062_v30 = vsel %vm1397_vm3, %v1390_v44, %v1399_v33  ;;  %v1395_v58 = vpop.f32.mrb[7].mxu0  ;;  %v1437_v33 = vmul.f32 %v1431_v50, %v2581_v7  ;;  %vm3678_vm3 = vmmov %vm3673_vm1 }
 0x420   : > { %1404 = vrot.lane.b32.xlu0 %v3062_v30, %s2284_s29  ;;  %v3078_v29 = vsel %vm1398_vm11, %v1392_v26, %v1400_v34  ;;  %v1451_v26 = vsel %vm682_vm7, %v1447_v46, %v1443_v35  ;;  %v1449_v34 = vsel %vm682_vm7, %v1443_v35, %v1447_v46  ;;  %v1521_v35 = vpop.permute.xlu1 %1520  ;;  %vm3679_vm11 = vmmov %vm3673_vm1 }
 0x421   : > { %v1454_v21 = vmul.f32 %v1451_v26, %v2597_v4 }
 0x424   : > { %1422 = vrot.lane.b32.xlu0 %v3062_v30, %s2282_s25 }
 0x428   : > { %1440 = vrot.lane.b32.xlu0 %v3062_v30, %s2285_s30 }
 0x42c   : > { %1458 = vrot.lane.b32.xlu0 %v3062_v30, %s2283_s28 }
 0x430   : > { %1482 = vrot.lane.b32.xlu0 %v3062_v30, %s2286_s15 }
 0x434   : > { %1500 = vrot.lane.b32.xlu0 %v3062_v30, %s2288_s18 }
 0x438   : > { %1518 = vrot.lane.b32.xlu0 %v3062_v30, %s2287_s16 }
 0x43c   : > { %1408 = vrot.lane.b32.xlu0 %v3078_v29, %s2284_s29 }
 0x440   : > { %1426 = vrot.lane.b32.xlu0 %v3078_v29, %s2282_s25 }
 0x444   : > { %1444 = vrot.lane.b32.xlu0 %v3078_v29, %s2285_s30 }
 0x448   : > { %1462 = vrot.lane.b32.xlu0 %v3078_v29, %s2283_s28 }
 0x44c   : > { %1536 = vrot.lane.b32.xlu0 %v3062_v30, %s2289_s21 }
 0x450   : > { %1486 = vrot.lane.b32.xlu0 %v3078_v29, %s2286_s15 }
 0x454   : > { %1504 = vrot.lane.b32.xlu0 %v3078_v29, %s2288_s18 }
 0x458   : > { %1522 = vrot.lane.b32.xlu0 %v3078_v29, %s2287_s16 }
 0x45c   : > { %1540 = vrot.lane.b32.xlu0 %v3078_v29, %s2289_s21 }
 0x492   : > { %v1405_v62 = vpop.permute.xlu0 %1404 }
 0x496   : > { %v1423_v24 = vpop.permute.xlu0 %1422 }
 0x49a   : > { %v1441_v36 = vpop.permute.xlu0 %1440 }
 0x49e   : > { %v1459_v63 = vpop.permute.xlu0 %1458 }
 0x4a2   : > { %v3108_v2 = vpop.permute.xlu0 %1482 }
 0x4a6   : > { %v3112_v0 = vpop.permute.xlu0 %1500 }
 0x4aa   : > { %v3114_v39 = vpop.permute.xlu0 %1518 }
 0x4ae   : > { %v1409_v41 = vpop.permute.xlu0 %1408 }
 0x4af   : > { %v1412_v56 = vsel %vm628_vm5, %v1405_v62, %v1409_v41  ;;  %v1414_v43 = vsel %vm628_vm5, %v1409_v41, %v1405_v62  ;;  %v1467_v41 = vsel %vm709_vm4, %v1461_v32, %v1465_v54  ;;  %v3192_v54 = vmul.f32 %v3078_v29, %v2542_v51 }
 0x4b0   : > { %v3131_v47 = vmul.f32 %v1414_v43, %v2563_v60  ;;  %v3134_v8 = vmul.f32 %v1412_v56, %v2567_v61  ;;  %v1472_v43 = vmul.f32 %v1469_v55, %v2586_v10  ;;  %v1473_v50 = vmul.f32 %v1467_v41, %v2594_v13 }
 0x4b1   : > { %v1491_v29 = vsel %vm3672_vm14, %v3106_v3, %v3110_v28  ;;  %v1509_v41 = vsel %vm777_vm13, %v3118_v45, %v3138_v40 }
 0x4b2   : > { %v1420_v42 = vpack.c.bf16 %v1418_v12, %v3131_v47  ;;  %v1427_v9 = vpop.permute.xlu0 %1426  ;;  %v1421_v48 = vpack.c.bf16 %v1419_v23, %v3134_v8 }
 0x4b3   : > { %v1430_v25 = vsel %vm655_vm6, %v1423_v24, %v1427_v9  ;;  %v1432_v44 = vsel %vm655_vm6, %v1427_v9, %v1423_v24  ;;  %v1455_v24 = vmul.f32 %v1449_v34, %v2603_v16  ;;  %v1525_v9 = vpop.permute.xlu1 %1524  ;;  %v1493_v34 = vsel %vm3673_vm1, %v3110_v28, %v3106_v3 }
 0x4b4   : > { %v3151_v19 = vmul.f32 %v1432_v44, %v2577_v6  ;;  %v3154_v58 = vmul.f32 %v1430_v25, %v2581_v7  ;;  %1564 = vmatprep.subr.bf16.mxu1 %v1421_v48  ;;  %v3671_v25 = vld [vmem:[#allocation10_spill] sm:$0xff]  ;;  %v1497_v3 = vmul.f32 %v1493_v34, %v2616_v22 }
 0x4b5   : > { %1565 = vmatpush1.bf16.msra.mxu1 %v1420_v42  ;;  %v1479_v44 = vmul.f32 %v3671_v25, %v2542_v51 }
 0x4b6   : > { %v1438_v57 = vpack.c.bf16 %v1436_v59, %v3151_v19  ;;  %v1445_v14 = vpop.permute.xlu0 %1444  ;;  %v1439_v27 = vpack.c.bf16 %v1437_v33, %v3154_v58  ;;  %v3200_v33 = vmul.f32 %v3062_v30, %v2545_v52 }
 0x4b7   : > { %v1448_v1 = vsel %vm682_vm7, %v1441_v36, %v1445_v14  ;;  %v1450_v62 = vsel %vm682_vm7, %v1445_v14, %v1441_v36  ;;  %v1481_v26 = vpack.c.bf16 %v1479_v44, %v3192_v54  ;;  %v1539_v28 = vpop.permute.xlu1 %1538 }
 0x4b8   : > { %v3169_v46 = vmul.f32 %v1450_v62, %v2597_v4  ;;  %v3172_v31 = vmul.f32 %v1448_v1, %v2603_v16  ;;  %1566 = vmatprep.subr.bf16.mxu1 %v1439_v27  ;;  %v1496_v62 = vmul.f32 %v1491_v29, %v2606_v17 }
 0x4b9   : > { %1567 = vmatpush1.bf16.msra.mxu1 %v1438_v57  ;;  %v3674_v57 = vld [vmem:[#allocation9_spill] sm:$0xff] }
 0x4ba   : > { %v1456_v12 = vpack.c.bf16 %v1454_v21, %v3169_v46  ;;  %v1463_v36 = vpop.permute.xlu0 %1462  ;;  %v1457_v56 = vpack.c.bf16 %v1455_v24, %v3172_v31  ;;  %v1478_v14 = vmul.f32 %v3674_v57, %v2545_v52 }
 0x4bb   : > { %v1466_v23 = vsel %vm709_vm4, %v1459_v63, %v1463_v36  ;;  %v1468_v20 = vsel %vm709_vm4, %v1463_v36, %v1459_v63  ;;  %v1543_v25 = vpop.permute.xlu1 %1542 }
 0x4bc   : > { %v3185_v42 = vmul.f32 %v1468_v20, %v2586_v10  ;;  %v3188_v32 = vmul.f32 %v1466_v23, %v2594_v13  ;;  %1568 = vmatprep.subr.bf16.mxu1 %v1457_v56  ;;  %v1480_v1 = vpack.c.bf16 %v1478_v14, %v3200_v33  ;;  %v1514_v20 = vmul.f32 %v1509_v41, %v2683_v37 }
 0x4bd   : > { %1569 = vmatpush1.bf16.msra.mxu1 %v1456_v12 }
 0x4be   : > { %v1474_v48 = vpack.c.bf16 %v1472_v43, %v3185_v42  ;;  %v1537_v59 = vpop.permute.xlu0 %1536  ;;  %v1475_v63 = vpack.c.bf16 %v1473_v50, %v3188_v32 }
 0x4c0   : > { %1570 = vmatprep.subr.bf16.mxu1 %v1475_v63  ;;  %v1529_v63 = vsel %vm804_vm9, %v1525_v9, %v1521_v35 }
 0x4c1   : > { %1571 = vmatpush1.bf16.msra.mxu1 %v1474_v48  ;;  %v1527_v48 = vsel %vm804_vm9, %v1521_v35, %v1525_v9  ;;  %v1533_v14 = vmul.f32 %v1529_v63, %v2670_v18 }
 0x4c2   : > { %v1487_v27 = vpop.permute.xlu0 %1486  ;;  %1572 = vmatprep.subr.bf16.mxu1 %v1481_v26  ;;  %v1532_v57 = vmul.f32 %v1527_v48, %v2667_v15 }
 0x4c3   : > { %v1490_v30 = vsel %vm3675_vm10, %v3108_v2, %v1487_v27  ;;  %v1492_v21 = vsel %vm3676_vm15, %v1487_v27, %v3108_v2  ;;  %v1511_v2 = vsel %vm777_vm13, %v3138_v40, %v3118_v45  ;;  %v1545_v27 = vsel %vm831_vm12, %v1539_v28, %v1543_v25 }
 0x4c4   : > { %v3223_v24 = vmul.f32 %v1490_v30, %v2606_v17  ;;  %v3226_v55 = vmul.f32 %v1492_v21, %v2616_v22  ;;  %v1515_v50 = vmul.f32 %v1511_v2, %v2686_v38  ;;  %v1547_v30 = vsel %vm831_vm12, %v1543_v25, %v1539_v28 }
 0x4c5   : > { %1573 = vmatpush1.bf16.msra.mxu1 %v1480_v1  ;;  %v1550_v41 = vmul.f32 %v2787_v11, %v1545_v27  ;;  %v1551_v2 = vmul.f32 %v2792_v5, %v1547_v30 }
 0x4c6   : > { %v1498_v12 = vpack.c.bf16 %v1496_v62, %v3223_v24  ;;  %v1505_v36 = vpop.permute.xlu0 %1504  ;;  %v1499_v56 = vpack.c.bf16 %v1497_v3, %v3226_v55 }
 0x4c7   : > { %v1508_v43 = vsel %vm777_vm13, %v3112_v0, %v1505_v36  ;;  %v1510_v23 = vsel %vm777_vm13, %v1505_v36, %v3112_v0 }
 0x4c8   : > { %v3247_v45 = vmul.f32 %v1508_v43, %v2683_v37  ;;  %v3250_v40 = vmul.f32 %v1510_v23, %v2686_v38  ;;  %1574 = vmatprep.subr.bf16.mxu1 %v1499_v56  ;;  %v3677_v43 = vmov 0  }
 0x4c9   : > { %1575 = vmatpush1.bf16.msra.mxu1 %v1498_v12 }
 0x4ca   : > { %v1516_v0 = vpack.c.bf16 %v1514_v20, %v3247_v45  ;;  %v1523_v44 = vpop.permute.xlu0 %1522  ;;  %v1517_v26 = vpack.c.bf16 %v1515_v50, %v3250_v40 }
 0x4cb   : > { %v1526_v29 = vsel %vm804_vm9, %v3114_v39, %v1523_v44  ;;  %v1528_v34 = vsel %vm804_vm9, %v1523_v44, %v3114_v39 }
 0x4cc   : > { %v3267_v35 = vmul.f32 %v1526_v29, %v2667_v15  ;;  %v3270_v9 = vmul.f32 %v1528_v34, %v2670_v18  ;;  %1576 = vmatprep.subr.bf16.mxu1 %v1517_v26 }
 0x4cd   : > { %1577 = vmatpush1.bf16.msra.mxu1 %v1516_v0 }
 0x4ce   : > { %v1534_v39 = vpack.c.bf16 %v1532_v57, %v3267_v35  ;;  %v1541_v21 = vpop.permute.xlu0 %1540  ;;  %v1535_v1 = vpack.c.bf16 %v1533_v14, %v3270_v9 }
 0x4cf   : > { %v1544_v62 = vsel %vm831_vm12, %v1537_v59, %v1541_v21  ;;  %v1546_v3 = vsel %vm831_vm12, %v1541_v21, %v1537_v59  ;;  %v2230_v59 = vcombine.low %v3097_v49, %v3097_v49  ;;  %v3321_v49 = vld [vmem:[%s3625_s8] sm:$0xff] }
 0x4d0   : > { %v3285_v12 = vmul.f32 %v2787_v11, %v1544_v62  ;;  %v3288_v28 = vmul.f32 %v2792_v5, %v1546_v3  ;;  %1578 = vmatprep.subr.bf16.mxu1 %v1535_v1  ;;  %v2234_v0 = vcombine.high %v3321_v49, %v3321_v49 }
 0x4d1   : > { %1579 = vmatpush1.bf16.msra.mxu1 %v1534_v39 }
 0x4d2   : > { %v1552_v36 = vpack.c.bf16 %v1550_v41, %v3285_v12  ;;  %v1553_v56 = vpack.c.bf16 %v1551_v2, %v3288_v28  ;;  %2235 = vmatprep.mubr.msk.bf16.mxu0 %vm1560_vm2, %v2234_v0  ;;  %vm3680_vm2 = vcmask 1043456  }
 0x4d3   : > { %vm3681_vm14 = vmmov %vm3680_vm2 }
 0x4d4   : > { %1580 = vmatprep.subr.bf16.mxu1 %v1553_v56  ;;  %vm3682_vm1 = vmmov %vm3680_vm2 }
 0x4d5   : > { %1581 = vmatpush1.bf16.msra.mxu1 %v1552_v36  ;;  %vm3683_vm10 = vmmov %vm3682_vm1 }
 0x4d6   : > { %vm3684_vm15 = vmmov %vm3682_vm1 }
 0x4d8   : > { %1597 = vmatmul.mubr.bf16.vlgmr.msra.gmra.mrb[4].mxu1 %v2230_v59 }
 0x4d9   : > { %1929 = vmatprep.mubr.bf16.mxu1 %v3677_v43 }
 0x5ab   : > { %v1598_v23 = vpop.f32.mrb[4].mxu1 }
 0x5ac   : > { %vm1605_vm8 = vcmp.gt.f32.partialorder %v1598_v23, 0.0  ;;  %v1607_v11 = vmul.f32 0.25, %v1598_v23  ;;  %v1600_v20 = vpop.f32.mrb[5].mxu1 }
 0x5ad   : > { %vm1606_vm0 = vcmp.gt.f32.partialorder %v1600_v20, 0.0  ;;  %v1608_v5 = vmul.f32 0.25, %v1600_v20  ;;  %v1602_v50 = vpop.f32.mrb[6].mxu1 }
 0x5ae   : > { %v3295_v48 = vsel %vm1605_vm8, %v1598_v23, %v1607_v11  ;;  %v1603_v63 = vpop.f32.mrb[7].mxu1  ;;  %vm3685_vm8 = vmmov %vm3682_vm1 }
 0x5af   : > { %v1610_v25 = vsel %vm1606_vm0, %v1600_v20, %v1608_v5  ;;  %1612 = vrot.lane.b32.xlu0 %v3295_v48, %s2284_s29  ;;  %vm3686_vm0 = vmmov %vm3682_vm1 }
 0x5b0   : > { %1614 = vrot.lane.b32.xlu1 %v1610_v25, %s2284_s29 }
 0x5b3   : > { %1622 = vrot.lane.b32.xlu0 %v3295_v48, %s2282_s25 }
 0x5b4   : > { %1624 = vrot.lane.b32.xlu1 %v1610_v25, %s2282_s25 }
 0x5b7   : > { %1632 = vrot.lane.b32.xlu0 %v3295_v48, %s2285_s30 }
 0x5b8   : > { %1634 = vrot.lane.b32.xlu1 %v1610_v25, %s2285_s30 }
 0x5bb   : > { %1642 = vrot.lane.b32.xlu0 %v3295_v48, %s2283_s28 }
 0x5bc   : > { %1644 = vrot.lane.b32.xlu1 %v1610_v25, %s2283_s28 }
 0x5bf   : > { %1656 = vrot.lane.b32.xlu0 %v3295_v48, %s2286_s15 }
 0x5c0   : > { %1658 = vrot.lane.b32.xlu1 %v1610_v25, %s2286_s15 }
 0x5c3   : > { %1666 = vrot.lane.b32.xlu0 %v3295_v48, %s2288_s18 }
 0x5c4   : > { %1668 = vrot.lane.b32.xlu1 %v1610_v25, %s2288_s18 }
 0x5c7   : > { %1676 = vrot.lane.b32.xlu0 %v3295_v48, %s2287_s16 }
 0x5c8   : > { %1678 = vrot.lane.b32.xlu1 %v1610_v25, %s2287_s16 }
 0x5cb   : > { %1686 = vrot.lane.b32.xlu0 %v3295_v48, %s2289_s21 }
 0x5cc   : > { %1688 = vrot.lane.b32.xlu1 %v1610_v25, %s2289_s21 }
 0x621   : > { %v1613_v44 = vpop.permute.xlu0 %1612 }
 0x622   : > { %v1615_v26 = vpop.permute.xlu1 %1614 }
 0x623   : > { %v1616_v29 = vsel %vm628_vm5, %v1613_v44, %v1615_v26  ;;  %v1617_v34 = vsel %vm628_vm5, %v1615_v26, %v1613_v44  ;;  %v3380_v26 = vmul.f32 %v1610_v25, %v2542_v51 }
 0x624   : > { %v3334_v57 = vmul.f32 %v1617_v34, %v2563_v60  ;;  %v3337_v14 = vmul.f32 %v1616_v29, %v2567_v61 }
 0x625   : > { %v1623_v27 = vpop.permute.xlu0 %1622 }
 0x626   : > { %v1620_v30 = vpack.c.bf16 %v3334_v57, %v3131_v47  ;;  %v1625_v39 = vpop.permute.xlu1 %1624  ;;  %v1621_v21 = vpack.c.bf16 %v3337_v14, %v3134_v8 }
 0x627   : > { %v1626_v1 = vsel %vm655_vm6, %v1623_v27, %v1625_v39  ;;  %v1627_v62 = vsel %vm655_vm6, %v1625_v39, %v1623_v27 }
 0x628   : > { %v3348_v3 = vmul.f32 %v1627_v62, %v2577_v6  ;;  %v3351_v41 = vmul.f32 %v1626_v1, %v2581_v7  ;;  %1705 = vmatprep.subr.bf16.mxu0 %v1621_v21 }
 0x629   : > { %v1633_v2 = vpop.permute.xlu0 %1632  ;;  %1706 = vmatpush1.bf16.msra.mxu0 %v1620_v30  ;;  %v3389_v30 = vmul.f32 %v3295_v48, %v2545_v52 }
 0x62a   : > { %v1630_v47 = vpack.c.bf16 %v3348_v3, %v3151_v19  ;;  %v1635_v36 = vpop.permute.xlu1 %1634  ;;  %v1631_v8 = vpack.c.bf16 %v3351_v41, %v3154_v58 }
 0x62b   : > { %v1636_v56 = vsel %vm682_vm7, %v1633_v2, %v1635_v36  ;;  %v1637_v59 = vsel %vm682_vm7, %v1635_v36, %v1633_v2  ;;  %v1654_v62 = vpack.c.bf16 %v3389_v30, %v3200_v33 }
 0x62c   : > { %v3362_v23 = vmul.f32 %v1637_v59, %v2597_v4  ;;  %v3365_v11 = vmul.f32 %v1636_v56, %v2603_v16  ;;  %1707 = vmatprep.subr.bf16.mxu0 %v1631_v8 }
 0x62d   : > { %v1643_v20 = vpop.permute.xlu0 %1642  ;;  %1708 = vmatpush1.bf16.msra.mxu0 %v1630_v47 }
 0x62e   : > { %v1640_v19 = vpack.c.bf16 %v3362_v23, %v3169_v46  ;;  %v1645_v5 = vpop.permute.xlu1 %1644  ;;  %v1641_v58 = vpack.c.bf16 %v3365_v11, %v3172_v31 }
 0x62f   : > { %v1646_v50 = vsel %vm709_vm4, %v1643_v20, %v1645_v5  ;;  %v1647_v63 = vsel %vm709_vm4, %v1645_v5, %v1643_v20 }
 0x630   : > { %v3376_v0 = vmul.f32 %v1647_v63, %v2586_v10  ;;  %v1649_v44 = vmul.f32 %v1646_v50, %v2594_v13  ;;  %1709 = vmatprep.subr.bf16.mxu0 %v1641_v58 }
 0x631   : > { %v1657_v46 = vpop.permute.xlu0 %1656  ;;  %1710 = vmatpush1.bf16.msra.mxu0 %v1640_v19 }
 0x632   : > { %v1650_v31 = vpack.c.bf16 %v3376_v0, %v3185_v42  ;;  %v1659_v29 = vpop.permute.xlu1 %1658  ;;  %v1651_v34 = vpack.c.bf16 %v1649_v44, %v3188_v32  ;;  %v1655_v42 = vpack.c.bf16 %v3380_v26, %v3192_v54 }
 0x633   : > { %v1661_v27 = vsel %vm3678_vm3, %v1659_v29, %v1657_v46  ;;  %v1660_v39 = vsel %vm3679_vm11, %v1657_v46, %v1659_v29  ;;  %vm3687_vm3 = vmmov %vm3686_vm0 }
 0x634   : > { %v3394_v25 = vmul.f32 %v1661_v27, %v2616_v22  ;;  %1711 = vmatprep.subr.bf16.mxu0 %v1651_v34  ;;  %v3399_v1 = vmul.f32 %v1660_v39, %v2606_v17  ;;  %v3444_v27 = vld [vmem:[%s3617_s0 + $0x10] ss:$0 sm:$0xff]  ;;  %vm3688_vm11 = vmmov %vm3686_vm0 }
 0x635   : > { %v1667_v21 = vpop.permute.xlu0 %1666  ;;  %1712 = vmatpush1.bf16.msra.mxu0 %v1650_v31  ;;  %v3434_v31 = vld [vmem:[%s3617_s0 + $0x18] ss:$0 sm:$0xff] }
 0x636   : > { %v1669_v32 = vpop.permute.xlu1 %1668  ;;  %1713 = vmatprep.subr.bf16.mxu0 %v1655_v42  ;;  %v1665_v54 = vpack.c.bf16 %v3394_v25, %v3226_v55  ;;  %v1664_v56 = vpack.c.bf16 %v3399_v1, %v3223_v24  ;;  %v1941_v42 = vpack.c.bf16 %v3348_v3, %v3348_v3 }
 0x637   : > { %v1671_v48 = vsel %vm777_vm13, %v1669_v32, %v1667_v21  ;;  %v1670_v2 = vsel %vm777_vm13, %v1667_v21, %v1669_v32  ;;  %v1946_v32 = vpack.c.bf16 %v1649_v44, %v1649_v44  ;;  %v1939_v44 = vpack.c.bf16 %v3334_v57, %v3334_v57 }
 0x638   : > { %v3408_v47 = vmul.f32 %v1671_v48, %v2686_v38  ;;  %v3415_v59 = vmul.f32 %v1670_v2, %v2683_v37  ;;  %v1959_v48 = vrot.slane %v1941_v42, 4  ;;  %v2233_v2 = vcombine.low %v3321_v49, %v3321_v49 }
 0x639   : > { %v1677_v36 = vpop.permute.xlu0 %1676  ;;  %1714 = vmatpush1.bf16.msra.mxu0 %v1654_v62  ;;  %v1945_v62 = vpack.c.bf16 %v3376_v0, %v3376_v0  ;;  %v1949_v0 = vpack.c.bf16 %v3399_v1, %v3399_v1  ;;  %v1943_v57 = vpack.c.bf16 %v3362_v23, %v3362_v23 }
 0x63a   : > { %v1679_v8 = vpop.permute.xlu1 %1678  ;;  %1715 = vmatprep.subr.bf16.mxu0 %v1665_v54  ;;  %v1675_v55 = vpack.c.bf16 %v3408_v47, %v3250_v40  ;;  %v1674_v24 = vpack.c.bf16 %v3415_v59, %v3247_v45  ;;  %v1942_v45 = vpack.c.bf16 %v3351_v41, %v3351_v41  ;;  %v1940_v41 = vpack.c.bf16 %v3337_v14, %v3337_v14 }
 0x63b   : > { %v1681_v33 = vsel %vm804_vm9, %v1679_v8, %v1677_v36  ;;  %v1680_v20 = vsel %vm804_vm9, %v1677_v36, %v1679_v8  ;;  %v1964_v54 = vrot.slane %v1946_v32, 4  ;;  %v1963_v14 = vrot.slane %v1945_v62, 4 }
 0x63c   : > { %v1683_v19 = vmul.f32 %v1681_v33, %v2670_v18  ;;  %v1682_v50 = vmul.f32 %v1680_v20, %v2667_v15  ;;  %v1975_v49 = vsel %vm3681_vm14, %v1939_v44, %v1959_v48 }
 0x63d   : > { %v1687_v5 = vpop.permute.xlu0 %1686  ;;  %1716 = vmatpush1.bf16.msra.mxu0 %v1664_v56  ;;  %v1967_v56 = vrot.slane %v1949_v0, 4  ;;  %v1983_v1 = vsel %vm3683_vm10, %v1943_v57, %v1963_v14  ;;  %vm1887_vm10 = vcmask 588800  }
 0x63e   : > { %v1689_v58 = vpop.permute.xlu1 %1688  ;;  %1717 = vmatprep.subr.bf16.mxu0 %v1675_v55  ;;  %v1685_v29 = vpack.c.bf16 %v1683_v19, %v3270_v9  ;;  %v1684_v34 = vpack.c.bf16 %v1682_v50, %v3267_v35  ;;  %v1960_v9 = vrot.slane %v1942_v45, 4  ;;  %v1954_v8 = vpack.c.bf16 %v1683_v19, %v1683_v19 }
 0x63f   : > { %v1691_v63 = vsel %vm831_vm12, %v1689_v58, %v1687_v5  ;;  %v1690_v46 = vsel %vm831_vm12, %v1687_v5, %v1689_v58  ;;  %v1953_v33 = vpack.c.bf16 %v1682_v50, %v1682_v50  ;;  %v1947_v55 = vpack.c.bf16 %v3389_v30, %v3389_v30 }
 0x640   : > { %v1693_v40 = vmul.f32 %v3434_v31, %v1691_v63  ;;  %v1692_v39 = vmul.f32 %v3444_v27, %v1690_v46  ;;  %v1979_v3 = vsel %vm3680_vm2, %v1940_v41, %v1960_v9  ;;  %v1972_v20 = vrot.slane %v1954_v8, 4  ;;  %vm3689_vm2 = vmmov %vm3686_vm0 }
 0x641   : > { %1718 = vmatpush1.bf16.msra.mxu0 %v1674_v24  ;;  %v1971_v23 = vrot.slane %v1953_v33, 4  ;;  %v1991_v5 = vsel %vm3685_vm8, %v1947_v55, %v1967_v56  ;;  %v1951_v58 = vpack.c.bf16 %v3415_v59, %v3415_v59  ;;  %vm3695_vm8 = vmmov %vm3686_vm0 }
 0x642   : > { %1719 = vmatprep.subr.bf16.mxu0 %v1685_v29  ;;  %v1695_v21 = vpack.c.bf16 %v1693_v40, %v3288_v28  ;;  %v1694_v35 = vpack.c.bf16 %v1692_v39, %v3285_v12  ;;  %v1950_v28 = vpack.c.bf16 %v3394_v25, %v3394_v25  ;;  %v1944_v12 = vpack.c.bf16 %v3365_v11, %v3365_v11 }
 0x643   : > { %v1948_v11 = vpack.c.bf16 %v3380_v26, %v3380_v26  ;;  %v1955_v24 = vpack.c.bf16 %v1692_v39, %v1692_v39  ;;  %v1956_v50 = vpack.c.bf16 %v1693_v40, %v1693_v40  ;;  %v1999_v63 = vsel %vm3687_vm3, %v1951_v58, %v1971_v23  ;;  %v1938_v40 = vld [vmem:[%s3627_s10] sm:$0x1]  ;;  %vm3696_vm3 = vmmov %vm3686_vm0 }
 0x644   : > { %v1968_v36 = vrot.slane %v1950_v28, 4  ;;  %v1987_v25 = vsel %vm3682_vm1, %v1944_v12, %v1964_v54 }
 0x645   : > { %1720 = vmatpush1.bf16.msra.mxu0 %v1684_v34  ;;  %v2011_v30 = vsel %vm3689_vm2, %v1955_v24, 0  ;;  %vm3700_vm2 = vmmov %vm3686_vm0 }
 0x646   : > { %1721 = vmatprep.subr.bf16.mxu0 %v1695_v21  ;;  %v1995_v19 = vsel %vm3684_vm15, %v1948_v11, %v1968_v36 }
 0x649   : > { %1722 = vmatpush1.bf16.msra.mxu0 %v1694_v35 }
 0x64a   : > { %2016 = vmatprep.subr.bf16.mxu0 %v1979_v3 }
 0x64c   : > { %1738 = vmatmul.mubr.bf16.vlgmr.msra.gmra.mrb[8].mxu0 %v2233_v2 }
 0x64d   : > { %2017 = vmatpush1.bf16.msra.mxu0 %v1975_v49  ;;  %2048 = vmatprep.mubr.bf16.mxu0 %v3677_v43  ;;  %v1952_v43 = vpack.c.bf16 %v3408_v47, %v3408_v47 }
 0x64e   : > { %2018 = vmatprep.subr.bf16.mxu0 %v1987_v25 }
 0x64f   : > { %v2003_v26 = vsel %vm3686_vm0, %v1952_v43, %v1972_v20 }
 0x651   : > { %2019 = vmatpush1.bf16.msra.mxu0 %v1983_v1 }
 0x652   : > { %2020 = vmatprep.subr.bf16.mxu0 %v1995_v19 }
 0x655   : > { %2021 = vmatpush1.bf16.msra.mxu0 %v1991_v5 }
 0x656   : > { %2022 = vmatprep.subr.bf16.mxu0 %v2003_v26 }
 0x659   : > { %2023 = vmatpush1.bf16.msra.mxu0 %v1999_v63 }
 0x65a   : > { %2238 = vmatprep.subr.msk.bf16.mxu0 %vm3688_vm11, %v1956_v50  ;;  %vm3699_vm11 = vmmov %vm3686_vm0 }
 0x65d   : > { %2025 = vmatpush1.bf16.msra.mxu0 %v2011_v30 }
 0x660   : > { %2239 = vmatmul.mubr.msk.bf16.vlgmr.msra.gmra.mrb[12].mxu0 %vm1887_vm10, %v1938_v40 }
 0x71f   : > { %v1739_v47 = vpop.f32.mrb[8].mxu0 }
 0x720   : > { %vm1746_vm14 = vcmp.gt.f32.partialorder %v1739_v47, 0.0  ;;  %v1748_v46 = vmul.f32 0.25, %v1739_v47  ;;  %v1741_v29 = vpop.f32.mrb[9].mxu0 }
 0x721   : > { %vm1747_vm1 = vcmp.gt.f32.partialorder %v1741_v29, 0.0  ;;  %v1749_v45 = vmul.f32 0.25, %v1741_v29  ;;  %v1743_v34 = vpop.f32.mrb[10].mxu0 }
 0x722   : > { %v3486_v42 = vsel %vm1746_vm14, %v1739_v47, %v1748_v46  ;;  %v1744_v59 = vpop.f32.mrb[11].mxu0 }
 0x723   : > { %v3488_v39 = vsel %vm1747_vm1, %v1741_v29, %v1749_v45  ;;  %1763 = vrot.lane.b32.xlu0 %v3486_v42, %s2282_s25 }
 0x724   : > { %1765 = vrot.lane.b32.xlu1 %v3488_v39, %s2282_s25  ;;  %v1794_v47 = vmul.f32 %v3488_v39, %v2542_v51 }
 0x727   : > { %1753 = vrot.lane.b32.xlu0 %v3486_v42, %s2284_s29 }
 0x728   : > { %1755 = vrot.lane.b32.xlu1 %v3488_v39, %s2284_s29 }
 0x72b   : > { %1783 = vrot.lane.b32.xlu0 %v3486_v42, %s2283_s28 }
 0x72c   : > { %1785 = vrot.lane.b32.xlu1 %v3488_v39, %s2283_s28 }
 0x72f   : > { %1773 = vrot.lane.b32.xlu0 %v3486_v42, %s2285_s30 }
 0x730   : > { %1775 = vrot.lane.b32.xlu1 %v3488_v39, %s2285_s30 }
 0x733   : > { %1797 = vrot.lane.b32.xlu0 %v3486_v42, %s2286_s15 }
 0x734   : > { %1799 = vrot.lane.b32.xlu1 %v3488_v39, %s2286_s15  ;;  %s2005_s15 = sld [smem:[#allocation3]] }
 0x737   : > { %1817 = vrot.lane.b32.xlu0 %v3486_v42, %s2287_s16 }
 0x738   : > { %1819 = vrot.lane.b32.xlu1 %v3488_v39, %s2287_s16 }
 0x73b   : > { %1807 = vrot.lane.b32.xlu0 %v3486_v42, %s2288_s18 }
 0x73c   : > { %1809 = vrot.lane.b32.xlu1 %v3488_v39, %s2288_s18 }
 0x73f   : > { %1827 = vrot.lane.b32.xlu0 %v3486_v42, %s2289_s21 }
 0x740   : > { %1829 = vrot.lane.b32.xlu1 %v3488_v39, %s2289_s21  ;;  %s508_s21 = scalar_lea.vmem %s3630_s13, %s2385_s12 }
 0x795   : > { %v1764_v21 = vpop.permute.xlu0 %1763 }
 0x796   : > { %v1766_v9 = vpop.permute.xlu1 %1765 }
 0x797   : > { %v1767_v32 = vsel %vm655_vm6, %v1764_v21, %v1766_v9  ;;  %v1768_v41 = vsel %vm655_vm6, %v1766_v9, %v1764_v21  ;;  %vm3691_vm6 = vmmov %vm3686_vm0 }
 0x798   : > { %v1769_v35 = vmul.f32 %v1768_v41, %v2577_v6  ;;  %v1770_v48 = vmul.f32 %v1767_v32, %v2581_v7 }
 0x799   : > { %v1754_v62 = vpop.permute.xlu0 %1753 }
 0x79a   : > { %v1771_v2 = vpack.c.bf16 %v1769_v35, %v1769_v35  ;;  %v1772_v54 = vpack.c.bf16 %v1770_v48, %v1770_v48  ;;  %v1756_v28 = vpop.permute.xlu1 %1755 }
 0x79b   : > { %v1757_v3 = vsel %vm628_vm5, %v1754_v62, %v1756_v28  ;;  %v1758_v44 = vsel %vm628_vm5, %v1756_v28, %v1754_v62  ;;  %vm3690_vm5 = vmmov %vm3686_vm0 }
 0x79c   : > { %v1759_v12 = vmul.f32 %v1758_v44, %v2563_v60  ;;  %v1760_v14 = vmul.f32 %v1757_v3, %v2567_v61  ;;  %v1839_v49 = vrot.slane %v1771_v2, 4  ;;  %v1840_v36 = vrot.slane %v1772_v54, 4 }
 0x79d   : > { %v1784_v0 = vpop.permute.xlu0 %1783 }
 0x79e   : > { %v1761_v6 = vpack.c.bf16 %v1759_v12, %v1759_v12  ;;  %v1762_v8 = vpack.c.bf16 %v1760_v14, %v1760_v14  ;;  %v1786_v7 = vpop.permute.xlu1 %1785 }
 0x79f   : > { %v1787_v25 = vsel %vm709_vm4, %v1784_v0, %v1786_v7  ;;  %v1788_v57 = vsel %vm709_vm4, %v1786_v7, %v1784_v0  ;;  %vm3692_vm4 = vcmp.lt.s32.totalorder %v2548_v53, 127  ;;  %v1752_v53 = vld [vmem:[%s3626_s9] sm:$0x1] }
 0x7a0   : > { %v1789_v11 = vmul.f32 %v1788_v57, %v2586_v10  ;;  %v1790_v56 = vmul.f32 %v1787_v25, %v2594_v13  ;;  %v1859_v60 = vsel %vm3690_vm5, %v1762_v8, %v1840_v36  ;;  %v1855_v61 = vsel %vm3691_vm6, %v1761_v6, %v1839_v49  ;;  %vm3693_vm15 = vmmov %vm3692_vm4 }
 0x7a1   : > { %v1774_v33 = vpop.permute.xlu0 %1773  ;;  %1897 = vmatprep.subr.bf16.mxu1 %v1859_v60  ;;  %v2006_v60 = vstv %s2005_s15 }
 0x7a2   : > { %v1791_v1 = vpack.c.bf16 %v1789_v11, %v1789_v11  ;;  %v1792_v20 = vpack.c.bf16 %v1790_v56, %v1790_v56  ;;  %1898 = vmatpush1.bf16.msra.mxu1 %v1855_v61  ;;  %v1776_v19 = vpop.permute.xlu1 %1775  ;;  %v2050_v61 = vpop.f32.mrb[12].mxu0 }
 0x7a3   : > { %v1777_v55 = vsel %vm682_vm7, %v1774_v33, %v1776_v19  ;;  %v1778_v43 = vsel %vm682_vm7, %v1776_v19, %v1774_v33  ;;  %vm3694_vm7 = vmmov %vm3686_vm0 }
 0x7a4   : > { %v1779_v10 = vmul.f32 %v1778_v43, %v2597_v4  ;;  %v1780_v13 = vmul.f32 %v1777_v55, %v2603_v16  ;;  %v1843_v5 = vrot.slane %v1791_v1, 4  ;;  %v1844_v26 = vrot.slane %v1792_v20, 4  ;;  %v2052_v20 = vpop.f32.mrb[13].mxu0  ;;  %v3701_v43 = vld [vmem:[#allocation5_spill] sm:$0xff] }
 0x7a5   : > { %v1798_v23 = vpop.permute.xlu0 %1797  ;;  %v1793_v4 = vmul.f32 %v3486_v42, %v2545_v52  ;;  %v1796_v42 = vpack.c.bf16 %v1794_v47, %v1794_v47  ;;  %v2051_v1 = vadd.f32 %v2050_v61, %v2006_v60  ;;  %v2053_v19 = vadd.f32 %v2052_v20, %v2006_v60  ;;  %v2054_v55 = vpop.f32.mrb[14].mxu0 }
 0x7a6   : > { %v1781_v58 = vpack.c.bf16 %v1779_v10, %v1779_v10  ;;  %v1782_v24 = vpack.c.bf16 %v1780_v13, %v1780_v13  ;;  %v1800_v50 = vpop.permute.xlu1 %1799  ;;  %v2055_v13 = vpop.f32.mrb[15].mxu0 }
 0x7a7   : > { %v1801_v63 = vsel %vm3692_vm4, %v1798_v23, %v1800_v50  ;;  %v1802_v30 = vsel %vm3693_vm15, %v1800_v50, %v1798_v23  ;;  %v2082_v10 = vadd.f32 %v2051_v1, %v3701_v43  ;;  %v3702_v23 = vld [vmem:[#allocation4_spill] sm:$0xff] }
 0x7a8   : > { %v1803_v16 = vmul.f32 %v1801_v63, %v2606_v17  ;;  %v1804_v46 = vmul.f32 %v1802_v30, %v2616_v22  ;;  %v1867_v29 = vsel %vm3694_vm7, %v1782_v24, %v1844_v26  ;;  %v1863_v45 = vsel %vm3695_vm8, %v1781_v58, %v1843_v5  ;;  %v3703_v26 = vld [vmem:[#allocation6_spill] sm:$0xff] }
 0x7a9   : > { %v1818_v34 = vpop.permute.xlu0 %1817  ;;  %1899 = vmatprep.subr.bf16.mxu1 %v1867_v29  ;;  %v1795_v17 = vpack.c.bf16 %v1793_v4, %v1793_v4  ;;  %v2083_v58 = vadd.f32 %v2053_v19, %v3703_v26  ;;  %v3704_v63 = vlaneseq  ;;  %v1886_v4 = vstv %s1885_s27 }
 0x7aa   : > { %v1805_v59 = vpack.c.bf16 %v1803_v16, %v1803_v16  ;;  %v1806_v40 = vpack.c.bf16 %v1804_v46, %v1804_v46  ;;  %1900 = vmatpush1.bf16.msra.mxu1 %v1863_v45  ;;  %v1820_v21 = vpop.permute.xlu1 %1819 }
 0x7ab   : > { %v1821_v51 = vsel %vm804_vm9, %v1818_v34, %v1820_v21  ;;  %v1822_v52 = vsel %vm804_vm9, %v1820_v21, %v1818_v34  ;;  %vm3697_vm9 = vmmov %vm3686_vm0  ;;  %v2086_v24 = vcombine.low %v2082_v10, %v2083_v58 }
 0x7ac   : > { %v1847_v39 = vrot.slane %v1805_v59, 4  ;;  %v1848_v22 = vrot.slane %v1806_v40, 4  ;;  %v1823_v9 = vmul.f32 %v1821_v51, %v2667_v15  ;;  %v1824_v32 = vmul.f32 %v1822_v52, %v2670_v18  ;;  %v3707_v59 = vld [vmem:[#allocation7_spill] sm:$0xff]  ;;  %v3708_v51 = vld [vmem:[#allocation8_spill] sm:$0xff] }
 0x7ad   : > { %v1808_v41 = vpop.permute.xlu0 %1807 }
 0x7ae   : > { %v1825_v35 = vpack.c.bf16 %v1823_v9, %v1823_v9  ;;  %v1826_v48 = vpack.c.bf16 %v1824_v32, %v1824_v32  ;;  %v1810_v62 = vpop.permute.xlu1 %1809  ;;  %v1875_v2 = vsel %vm3686_vm0, %v1796_v42, %v1848_v22  ;;  %v1871_v54 = vsel %vm3696_vm3, %v1795_v17, %v1847_v39 }
 0x7af   : > { %v1811_v28 = vsel %vm777_vm13, %v1808_v41, %v1810_v62  ;;  %v1812_v3 = vsel %vm777_vm13, %v1810_v62, %v1808_v41  ;;  %1901 = vmatprep.subr.bf16.mxu1 %v1875_v2  ;;  %vm3698_vm13 = vmmov %vm3686_vm0 }
 0x7b0   : > { %v1813_v44 = vmul.f32 %v1811_v28, %v2683_v37  ;;  %v1814_v15 = vmul.f32 %v1812_v3, %v2686_v38  ;;  %1902 = vmatpush1.bf16.msra.mxu1 %v1871_v54  ;;  %v1851_v12 = vrot.slane %v1825_v35, 4  ;;  %v1852_v14 = vrot.slane %v1826_v48, 4 }
 0x7b1   : > { %v1828_v18 = vpop.permute.xlu0 %1827 }
 0x7b2   : > { %v1815_v0 = vpack.c.bf16 %v1813_v44, %v1813_v44  ;;  %v1816_v49 = vpack.c.bf16 %v1814_v15, %v1814_v15  ;;  %v1830_v36 = vpop.permute.xlu1 %1829 }
 0x7b3   : > { %v1831_v6 = vsel %vm831_vm12, %v1828_v18, %v1830_v36  ;;  %v1832_v8 = vsel %vm831_vm12, %v1830_v36, %v1828_v18  ;;  %vm3600_vm12 = vcmp.lt.s32.totalorder %v3704_v63, 256 }
 0x7b4   : > { %v1833_v7 = vmul.f32 %v3444_v27, %v1831_v6  ;;  %v1834_v25 = vmul.f32 %v3434_v31, %v1832_v8  ;;  %v1883_v37 = vsel %vm3697_vm9, %v1816_v49, %v1852_v14  ;;  %v1879_v38 = vsel %vm3698_vm13, %v1815_v0, %v1851_v12 }
 0x7b5   : > { %1903 = vmatprep.subr.bf16.mxu1 %v1883_v37  ;;  %v2290_v31 = vmov 1966171168  }
 0x7b6   : > { %v1835_v57 = vpack.c.bf16 %v1833_v7, %v1833_v7  ;;  %v1836_v11 = vpack.c.bf16 %v1834_v25, %v1834_v25  ;;  %1904 = vmatpush1.bf16.msra.mxu1 %v1879_v38  ;;  %v2063_v27 = vunpack.c.l.s4 %v2290_v31 }
 0x7b8   : > { %2236 = vmatprep.subr.msk.bf16.mxu1 %vm3699_vm11, %v1836_v11  ;;  %v1892_v56 = vsel %vm3700_vm2, %v1835_v57, 0  ;;  %v2064_v33 = vunpack.c.0.s8 %v2063_v27 }
 0x7ba   : > { %1906 = vmatpush1.bf16.msra.mxu1 %v1892_v56  ;;  %v2067_v5 = vsub.s32 %v2064_v33, %v3702_v23 }
 0x7bc   : > { %v2093_v50 = vrot.slane %v2086_v24, %v2067_v5 }
 0x7bd   : > { %2237 = vmatmul.mubr.msk.bf16.vlgmr.msra.gmra.mrb[8].mxu1 %vm1887_vm10, %v1752_v53 }
 0x7be   : > { %v2100_v47 = vrot.slane %v2093_v50, %v2067_v5 }
 0x7c0   : > { %2102 = vst.msk [vmem:[%s508_s21] sm:$0x3] %vm3600_vm12, %v2100_v47 }
 0x890   : > { %v1931_v16 = vpop.f32.mrb[8].mxu1 }
 0x891   : > { %v1932_v46 = vadd.f32 %v1931_v16, %v1886_v4  ;;  %v1933_v29 = vpop.f32.mrb[9].mxu1 }
 0x892   : > { %v1934_v45 = vadd.f32 %v1933_v29, %v1886_v4  ;;  %v1935_v34 = vpop.f32.mrb[10].mxu1 }
 0x893   : > { %v2057_v40 = vadd.f32 %v1932_v46, %v3707_v59  ;;  %v1936_v21 = vpop.f32.mrb[11].mxu1 }
 0x894   : > { %v2058_v52 = vadd.f32 %v1934_v45, %v3708_v51 }
 0x896   : > { %v2061_v42 = vcombine.low %v2057_v40, %v2058_v52 }
 0x898   : > { %v2068_v17 = vrot.slane %v2061_v42, %v2067_v5 }
 0x89a   : > { %v2075_v39 = vrot.slane %v2068_v17, %v2067_v5 }
 0x89c   : > { %2081 = vst.msk [vmem:[%s512_s20] sm:$0x3] %vm3600_vm12, %v2075_v39 }
 0x89d PF: > { %s27_s17 = sadd.s32 1, %s2279_s17  }
 0x89e   : > { %p24_p4 = scmp.ge.s32.totalorder %s27_s17, 4  }
 0x8a0   :  { %26 = sbr.rel (!%p24_p4) target bundleno = 3 (0x3), region = 120 }

</bundles_post_ra>
